<compile_context>
chip_gen: v5e
topology: v5e:2x2
jax: 0.10.0
libtpu: 0.0.40
codegen_flags: <defaults>
</compile_context>

<pallas_src>
import jax
import jax.numpy as jnp
from jax import lax
from jax.experimental import pallas as pl
from jax.experimental.pallas import tpu as pltpu

TEMPERATURE = 0.1
MARGIN = 0.5
ALPHA = 2.0        # exploited below as an explicit square (ALPHA == 2)
NORM_EPS = 1e-12   # F.normalize eps
EPS = 1e-10        # epsilon in the loss
_NORM_EPS_SQ = NORM_EPS * NORM_EPS
_INV_TEMP = 1.0 / TEMPERATURE


def _multi_positive_loss_kernel(q_ref, pos_ref, neg_ref, mask_ref, out_ref):
    # One batch tile per grid step.
    q = q_ref[...].astype(jnp.float32)        # [Bt, D]
    pos = pos_ref[...].astype(jnp.float32)    # [Bt, P, D]
    neg = neg_ref[...].astype(jnp.float32)    # [Bt, N, D]
    mask = mask_ref[...].astype(jnp.float32)  # [Bt, P]

    # Inverse L2 norms via rsqrt (EUP). rsqrt(max(ss, eps^2)) == 1/max(||x||, eps),
    # so x / max(||x||, eps) normalization never materializes normalized tensors.
    inv_q = lax.rsqrt(
        jnp.maximum(jnp.sum(q * q, axis=-1, keepdims=True), _NORM_EPS_SQ))    # [Bt, 1]
    inv_p = lax.rsqrt(jnp.maximum(jnp.sum(pos * pos, axis=-1), _NORM_EPS_SQ))  # [Bt, P]
    inv_n = lax.rsqrt(jnp.maximum(jnp.sum(neg * neg, axis=-1), _NORM_EPS_SQ))  # [Bt, N]

    # Fold 1/||q|| and 1/temperature into the query once per tile.
    qs = q * (inv_q * _INV_TEMP)                                               # [Bt, D]

    # D-reduction as VPU broadcast-multiply + lane-axis reduce (XLU slot).
    # No per-batch-element MXU matvecs (which reload the weight tile O(Bt) times).
    pos_scores = jnp.sum(qs[:, None, :] * pos, axis=-1) * inv_p                # [Bt, P]
    neg_scores = jnp.sum(qs[:, None, :] * neg, axis=-1) * inv_n                # [Bt, N]

    pos_scores = pos_scores * mask                                             # mask positives

    neg_max = jnp.max(neg_scores, axis=-1, keepdims=True)                      # [Bt, 1]
    pos_exp = jnp.exp(pos_scores - neg_max)                                    # [Bt, P]
    neg_exp = jnp.exp(neg_scores - neg_max)                                    # [Bt, N]

    pos_exp_sum = jnp.sum(pos_exp * mask, axis=-1, keepdims=True)              # [Bt, 1]
    neg_exp_sum = jnp.sum(neg_exp, axis=-1, keepdims=True)                     # [Bt, 1]

    pos_prob = (pos_exp_sum + EPS) / (pos_exp_sum + neg_exp_sum + EPS)         # [Bt, 1]
    w = 1.0 - pos_prob
    focal_rows = -jnp.log(pos_prob) * (w * w)                                  # (1-p)**ALPHA, ALPHA==2
    margin_rows = jnp.maximum(MARGIN - pos_scores, 0.0) * mask                 # [Bt, P]

    # Per-tile partial SUMS, packed into one (1, 1, 2) block -> single store,
    # single tiny output DMA per grid step. Wrapper divides by B / (B*P) once.
    focal_tile = jnp.sum(focal_rows, keepdims=True)                            # (1, 1)
    margin_tile = jnp.sum(margin_rows, keepdims=True)                          # (1, 1)
    out_ref[...] = jnp.concatenate([focal_tile, margin_tile], axis=-1).reshape(1, 1, 2)


def _vmem_capacity_bytes():
    """Physical VMEM per TensorCore (128 MiB v5e/v6e, 64 MiB v7x); safe fallback."""
    try:
        info = pltpu.get_tpu_info()
        cap = getattr(info, "vmem_capacity_bytes", None)
        if cap:
            return int(cap)
    except Exception:
        pass
    return 64 * 1024 * 1024  # conservative: v7x per-core capacity


def _pick_batch_tile(B, P, N, D, in_itemsize, budget_bytes):
    """Largest batch tile (multiple of 8, dividing B, keeping >=2 grid steps
    when possible so v7x megacore sharding has work) whose double-buffered
    input blocks PLUS in-kernel f32 working set fit the VMEM budget."""
    # Double-buffered input blocks per batch row (q + pos + neg + mask).
    in_row = (1 + P + N) * D * in_itemsize + P * 4
    # In-kernel f32 working set per row: upcasts + broadcast-product temporary
    # + score/exp/partials (approximate, deliberately generous).
    work_row = ((1 + P + N) * D + (P + N) * D + 8 * (P + N)) * 4
    per_row = 2 * in_row + work_row

    cands = [bt for bt in range(8, B + 1, 8) if B % bt == 0]
    if not cands:
        return B
    multi = [bt for bt in cands if B // bt >= 2]   # keep nb >= 2 (megacore)
    if multi:
        cands = multi
    fitting = [bt for bt in cands if bt * per_row <= budget_bytes]
    return max(fitting) if fitting else min(cands)


def multi_positive_loss(query_emb, pos_emb, neg_emb, pos_mask, *, block_b=None):
    B, D = query_emb.shape
    _, P, _ = pos_emb.shape
    _, N, _ = neg_emb.shape

    in_itemsize = jnp.dtype(query_emb.dtype).itemsize
    cap = _vmem_capacity_bytes()
    vmem_limit = int(cap * 0.85)        # scoped VMEM ceiling, leave headroom
    tile_budget = int(cap * 0.55)       # inputs (double-buffered) + working set

    if block_b is None:
        block_b = _pick_batch_tile(B, P, N, D, in_itemsize, tile_budget)
    assert B % block_b == 0, (B, block_b)
    nb = B // block_b

    # Advisory cost estimate so XLA schedules this custom call sensibly when
    # it is fused into a larger step.
    flops = int(B * (4 * (P + N) * D + 2 * D + 8 * (P + N)))
    transcendentals = int(B * (2 * (P + N) + 4))
    bytes_accessed = int(
        B * (1 + P + N) * D * in_itemsize
        + B * P * jnp.dtype(pos_mask.dtype).itemsize
        + nb * 2 * 4)

    parts = pl.pallas_call(
        _multi_positive_loss_kernel,
        out_shape=jax.ShapeDtypeStruct((nb, 1, 2), jnp.float32),
        grid_spec=pltpu.PrefetchScalarGridSpec(
            num_scalar_prefetch=0,
            grid=(nb,),
            in_specs=[
                pl.BlockSpec((block_b, D), lambda i: (i, 0)),        # query, squeezed
                pl.BlockSpec((block_b, P, D), lambda i: (i, 0, 0)),  # positives
                pl.BlockSpec((block_b, N, D), lambda i: (i, 0, 0)),  # negatives
                pl.BlockSpec((block_b, P), lambda i: (i, 0)),        # mask
            ],
            out_specs=pl.BlockSpec((1, 1, 2), lambda i: (i, 0, 0)),
        ),
        compiler_params=pltpu.CompilerParams(
            dimension_semantics=("parallel",),
            vmem_limit_bytes=vmem_limit,
        ),
        cost_estimate=pl.CostEstimate(
            flops=flops,
            transcendentals=transcendentals,
            bytes_accessed=bytes_accessed,
        ),
    )(query_emb, pos_emb, neg_emb, pos_mask)

    # Tiny final reduction (means over B and B*P) done once in the wrapper.
    focal = jnp.sum(parts[:, 0, 0]) / B
    margin = jnp.sum(parts[:, 0, 1]) / (B * P)
    return focal + margin


def _reference_loss(query_emb, pos_emb, neg_emb, pos_mask):
    # Pure-JAX mirror of the PyTorch forward (for correctness check).
    def l2norm(x):
        nrm = jnp.sqrt(jnp.sum(x * x, axis=-1, keepdims=True))
        return x / jnp.maximum(nrm, NORM_EPS)

    q_n = l2norm(query_emb)
    p_n = l2norm(pos_emb)
    n_n = l2norm(neg_emb)
    ps = jnp.sum(q_n[:, None, :] * p_n, axis=-1) / TEMPERATURE
    ns = jnp.sum(q_n[:, None, :] * n_n, axis=-1) / TEMPERATURE
    ps = ps * pos_mask
    nmax = jnp.max(ns, axis=1, keepdims=True)
    pe = jnp.exp(ps - nmax)
    ne = jnp.exp(ns - nmax)
    pes = jnp.sum(pe * pos_mask, axis=1)
    nes = jnp.sum(ne, axis=1)
    pp = (pes + EPS) / (pes + nes + EPS)
    pw = (1.0 - pp) ** ALPHA
    ml = jnp.mean(jnp.maximum(MARGIN - ps, 0.0) * pos_mask)
    return jnp.mean(-jnp.log(pp) * pw) + ml


if __name__ == "__main__":
    # Small deterministic shapes: batch=16 (2 tiles of 8 -> multi-step grid),
    # positives=8, negatives=16, embedding dim=128 (lane-aligned).
    B, P, N, D = 16, 8, 16, 128
    key = jax.random.PRNGKey(0)
    kq, kp, kn, km = jax.random.split(key, 4)

    query_emb = jax.random.normal(kq, (B, D), dtype=jnp.float32)
    pos_emb = jax.random.normal(kp, (B, P, D), dtype=jnp.float32)
    neg_emb = jax.random.normal(kn, (B, N, D), dtype=jnp.float32)
    # Binary positive mask with at least one positive per row.
    pos_mask = (jax.random.uniform(km, (B, P)) > 0.5).astype(jnp.float32)
    pos_mask = pos_mask.at[:, 0].set(1.0)

    # block_b=8 exercises the multi-tile grid + wrapper reduction path.
    loss = multi_positive_loss(query_emb, pos_emb, neg_emb, pos_mask, block_b=8)
    loss = jax.block_until_ready(loss)

    ref = _reference_loss(query_emb, pos_emb, neg_emb, pos_mask)
    assert jnp.allclose(loss, ref, rtol=2e-4, atol=2e-4), (loss, ref)

    print("KERNEL_OK")
</pallas_src>

<mosaic_0001>
module attributes {stable_mosaic.version = 11 : i64} {
  func.func @_multi_positive_loss_kernel(%arg0: i32, %arg1: memref<8x128xf32, #tpu.memory_space<vmem>>, %arg2: memref<8x8x128xf32, #tpu.memory_space<vmem>>, %arg3: memref<8x16x128xf32, #tpu.memory_space<vmem>>, %arg4: memref<8x8xf32, #tpu.memory_space<vmem>>, %arg5: memref<1x1x2xf32, #tpu.memory_space<vmem>>) attributes {dimension_semantics = [#tpu.dimension_semantics<parallel>], iteration_bounds = array<i64: 2>, scalar_prefetch = 0 : i64, scratch_operands = 0 : i64, tpu.core_type = #tpu.core_type<tc>, window_params = [{transform_indices = @transform_0, window_bounds = array<i64: 8, 128>}, {transform_indices = @transform_1, window_bounds = array<i64: 8, 8, 128>}, {transform_indices = @transform_2, window_bounds = array<i64: 8, 16, 128>}, {transform_indices = @transform_3, window_bounds = array<i64: 8, 8>}, {transform_indices = @transform_4, window_bounds = array<i64: 1, 1, 2>}]} {
    %c0 = arith.constant 0 : index
    %c0_0 = arith.constant 0 : index
    %0 = vector.load %arg1[%c0, %c0_0] : memref<8x128xf32, #tpu.memory_space<vmem>>, vector<8x128xf32>
    %c0_1 = arith.constant 0 : index
    %c0_2 = arith.constant 0 : index
    %c0_3 = arith.constant 0 : index
    %1 = vector.load %arg2[%c0_1, %c0_2, %c0_3] : memref<8x8x128xf32, #tpu.memory_space<vmem>>, vector<8x8x128xf32>
    %c0_4 = arith.constant 0 : index
    %c0_5 = arith.constant 0 : index
    %c0_6 = arith.constant 0 : index
    %2 = vector.load %arg3[%c0_4, %c0_5, %c0_6] : memref<8x16x128xf32, #tpu.memory_space<vmem>>, vector<8x16x128xf32>
    %c0_7 = arith.constant 0 : index
    %c0_8 = arith.constant 0 : index
    %3 = vector.load %arg4[%c0_7, %c0_8] : memref<8x8xf32, #tpu.memory_space<vmem>>, vector<8x8xf32>
    %4 = arith.mulf %0, %0 : vector<8x128xf32>
    %cst = arith.constant dense<0.000000e+00> : vector<8xf32>
    %5 = vector.multi_reduction <add>, %4, %cst [1] : vector<8x128xf32> to vector<8xf32>
    %6 = vector.shape_cast %5 : vector<8xf32> to vector<8x1xf32>
    %cst_9 = arith.constant 1.000000e-24 : f32
    %7 = vector.broadcast %cst_9 : f32 to vector<8x1xf32>
    %8 = arith.maximumf %6, %7 : vector<8x1xf32>
    %9 = math.rsqrt %8 : vector<8x1xf32>
    %10 = arith.mulf %1, %1 : vector<8x8x128xf32>
    %cst_10 = arith.constant dense<0.000000e+00> : vector<8x8xf32>
    %11 = vector.multi_reduction <add>, %10, %cst_10 [2] : vector<8x8x128xf32> to vector<8x8xf32>
    %cst_11 = arith.constant 1.000000e-24 : f32
    %12 = vector.broadcast %cst_11 : f32 to vector<8x8xf32>
    %13 = arith.maximumf %11, %12 : vector<8x8xf32>
    %14 = math.rsqrt %13 : vector<8x8xf32>
    %15 = arith.mulf %2, %2 : vector<8x16x128xf32>
    %cst_12 = arith.constant dense<0.000000e+00> : vector<8x16xf32>
    %16 = vector.multi_reduction <add>, %15, %cst_12 [2] : vector<8x16x128xf32> to vector<8x16xf32>
    %cst_13 = arith.constant 1.000000e-24 : f32
    %17 = vector.broadcast %cst_13 : f32 to vector<8x16xf32>
    %18 = arith.maximumf %16, %17 : vector<8x16xf32>
    %19 = math.rsqrt %18 : vector<8x16xf32>
    %cst_14 = arith.constant 1.000000e+01 : f32
    %20 = vector.broadcast %cst_14 : f32 to vector<8x1xf32>
    %21 = arith.mulf %9, %20 : vector<8x1xf32>
    %22 = vector.broadcast %21 : vector<8x1xf32> to vector<8x128xf32>
    %23 = arith.mulf %0, %22 : vector<8x128xf32>
    %24 = vector.shape_cast %23 : vector<8x128xf32> to vector<8x1x128xf32>
    %25 = vector.broadcast %24 : vector<8x1x128xf32> to vector<8x8x128xf32>
    %26 = arith.mulf %25, %1 : vector<8x8x128xf32>
    %cst_15 = arith.constant dense<0.000000e+00> : vector<8x8xf32>
    %27 = vector.multi_reduction <add>, %26, %cst_15 [2] : vector<8x8x128xf32> to vector<8x8xf32>
    %28 = arith.mulf %27, %14 : vector<8x8xf32>
    %29 = vector.shape_cast %23 : vector<8x128xf32> to vector<8x1x128xf32>
    %30 = vector.broadcast %29 : vector<8x1x128xf32> to vector<8x16x128xf32>
    %31 = arith.mulf %30, %2 : vector<8x16x128xf32>
    %cst_16 = arith.constant dense<0.000000e+00> : vector<8x16xf32>
    %32 = vector.multi_reduction <add>, %31, %cst_16 [2] : vector<8x16x128xf32> to vector<8x16xf32>
    %33 = arith.mulf %32, %19 : vector<8x16xf32>
    %34 = arith.mulf %28, %3 : vector<8x8xf32>
    %cst_17 = arith.constant dense<0xFF800000> : vector<8xf32>
    %35 = vector.multi_reduction <maximumf>, %33, %cst_17 [1] : vector<8x16xf32> to vector<8xf32>
    %36 = vector.shape_cast %35 : vector<8xf32> to vector<8x1xf32>
    %37 = vector.broadcast %36 : vector<8x1xf32> to vector<8x8xf32>
    %38 = arith.subf %34, %37 : vector<8x8xf32>
    %39 = math.exp %38 : vector<8x8xf32>
    %40 = vector.broadcast %36 : vector<8x1xf32> to vector<8x16xf32>
    %41 = arith.subf %33, %40 : vector<8x16xf32>
    %42 = math.exp %41 : vector<8x16xf32>
    %43 = arith.mulf %39, %3 : vector<8x8xf32>
    %cst_18 = arith.constant dense<0.000000e+00> : vector<8xf32>
    %44 = vector.multi_reduction <add>, %43, %cst_18 [1] : vector<8x8xf32> to vector<8xf32>
    %45 = vector.shape_cast %44 : vector<8xf32> to vector<8x1xf32>
    %cst_19 = arith.constant dense<0.000000e+00> : vector<8xf32>
    %46 = vector.multi_reduction <add>, %42, %cst_19 [1] : vector<8x16xf32> to vector<8xf32>
    %47 = vector.shape_cast %46 : vector<8xf32> to vector<8x1xf32>
    %cst_20 = arith.constant 1.000000e-10 : f32
    %48 = vector.broadcast %cst_20 : f32 to vector<8x1xf32>
    %49 = arith.addf %45, %48 : vector<8x1xf32>
    %50 = arith.addf %45, %47 : vector<8x1xf32>
    %cst_21 = arith.constant 1.000000e-10 : f32
    %51 = vector.broadcast %cst_21 : f32 to vector<8x1xf32>
    %52 = arith.addf %50, %51 : vector<8x1xf32>
    %53 = arith.divf %49, %52 : vector<8x1xf32>
    %cst_22 = arith.constant 1.000000e+00 : f32
    %54 = vector.broadcast %cst_22 : f32 to vector<8x1xf32>
    %55 = arith.subf %54, %53 : vector<8x1xf32>
    %56 = math.log %53 : vector<8x1xf32>
    %cst_23 = arith.constant 0.000000e+00 : f32
    %57 = vector.broadcast %cst_23 : f32 to vector<8x1xf32>
    %58 = arith.subf %57, %56 : vector<8x1xf32>
    %59 = arith.mulf %55, %55 : vector<8x1xf32>
    %60 = arith.mulf %58, %59 : vector<8x1xf32>
    %cst_24 = arith.constant 5.000000e-01 : f32
    %61 = vector.broadcast %cst_24 : f32 to vector<8x8xf32>
    %62 = arith.subf %61, %34 : vector<8x8xf32>
    %cst_25 = arith.constant 0.000000e+00 : f32
    %63 = vector.broadcast %cst_25 : f32 to vector<8x8xf32>
    %64 = arith.maximumf %62, %63 : vector<8x8xf32>
    %65 = arith.mulf %64, %3 : vector<8x8xf32>
    %66 = vector.shape_cast %60 : vector<8x1xf32> to vector<1x8x1xf32>
    %cst_26 = arith.constant dense<0.000000e+00> : vector<1xf32>
    %67 = vector.multi_reduction <add>, %66, %cst_26 [1, 2] : vector<1x8x1xf32> to vector<1xf32>
    %68 = vector.shape_cast %67 : vector<1xf32> to vector<1x1x1xf32>
    %69 = vector.extract %68[0, 0, 0] : f32 from vector<1x1x1xf32>
    %70 = vector.broadcast %69 : f32 to vector<1x1xf32>
    %71 = vector.shape_cast %65 : vector<8x8xf32> to vector<1x8x8xf32>
    %cst_27 = arith.constant dense<0.000000e+00> : vector<1xf32>
    %72 = vector.multi_reduction <add>, %71, %cst_27 [1, 2] : vector<1x8x8xf32> to vector<1xf32>
    %73 = vector.shape_cast %72 : vector<1xf32> to vector<1x1x1xf32>
    %74 = vector.extract %73[0, 0, 0] : f32 from vector<1x1x1xf32>
    %75 = vector.broadcast %74 : f32 to vector<1x1xf32>
    %76 = tpu.concatenate %70, %75 in 1 : vector<1x1xf32>, vector<1x1xf32> -> vector<1x2xf32>
    %77 = vector.shape_cast %76 : vector<1x2xf32> to vector<1x1x2xf32>
    %c0_28 = arith.constant 0 : index
    %c0_29 = arith.constant 0 : index
    %c0_30 = arith.constant 0 : index
    %78 = vector.load %arg5[%c0_28, %c0_29, %c0_30] : memref<1x1x2xf32, #tpu.memory_space<vmem>>, vector<1x1x2xf32>
    tpu.vector_store %arg5[%c0_28, %c0_29, %c0_30], %77 {strides = array<i32>} : memref<1x1x2xf32, #tpu.memory_space<vmem>>, vector<1x1x2xf32>,
    return
  }
  func.func @transform_0(%arg0: i32) -> (i32, i32) {
    %c0_i32 = arith.constant 0 : i32
    %c0_i32_0 = arith.constant 0 : i32
    return %arg0, %c0_i32 : i32, i32
  }
  func.func @transform_1(%arg0: i32) -> (i32, i32, i32) {
    %c0_i32 = arith.constant 0 : i32
    %c0_i32_0 = arith.constant 0 : i32
    %c0_i32_1 = arith.constant 0 : i32
    return %arg0, %c0_i32, %c0_i32_0 : i32, i32, i32
  }
  func.func @transform_2(%arg0: i32) -> (i32, i32, i32) {
    %c0_i32 = arith.constant 0 : i32
    %c0_i32_0 = arith.constant 0 : i32
    %c0_i32_1 = arith.constant 0 : i32
    return %arg0, %c0_i32, %c0_i32_0 : i32, i32, i32
  }
  func.func @transform_3(%arg0: i32) -> (i32, i32) {
    %c0_i32 = arith.constant 0 : i32
    %c0_i32_0 = arith.constant 0 : i32
    return %arg0, %c0_i32 : i32, i32
  }
  func.func @transform_4(%arg0: i32) -> (i32, i32, i32) {
    %c0_i32 = arith.constant 0 : i32
    %c0_i32_0 = arith.constant 0 : i32
    %c0_i32_1 = arith.constant 0 : i32
    return %arg0, %c0_i32, %c0_i32_0 : i32, i32, i32
  }
}

</mosaic_0001>

<bundles_post_ra>
// kernel: tpu_custom_call.1
= control target key start
LH: loop header
LB: loop body
LE: loop exit
PB: predicated region body
PF: predicated region fallthrough
CT: control target
= control target key end

     0   :  { %s3011_s0 = inlined_call_operand.vmem [shape: f32[16,128], index: 0, kind: input, shape index: {}]   ;;  %s3012_s1 = inlined_call_operand.hbm [shape: f32[16,8,128], index: 1, kind: input, shape index: {}]   ;;  %s3013_s2 = inlined_call_operand.hbm [shape: f32[16,16,128], index: 2, kind: input, shape index: {}]   ;;  %s3014_s3 = inlined_call_operand.vmem [shape: f32[16,8], index: 3, kind: input, shape index: {}]   ;;  %s3015_s4 = inlined_call_operand.hbm [shape: f32[2,1,2], index: 4, kind: output, shape index: {}]  }
   0x1   :  { %3019 = sst [smem:[#allocation23_spill]] %s3012_s1 }
   0x2   :  { %9 = vsyncpa [#allocation3], 0 }
   0x3   :  { %11 = vsyncpa [#allocation3 + $0x1], 0 }
   0x4   :  { %12 = vsyncpa [#allocation6], 0 }
   0x5   :  { %14 = vsyncpa [#allocation6 + $0x1], 0 }
   0x6   :  { %15 = vsyncpa [#allocation4], 0 }
   0x7   :  { %17 = vsyncpa [#allocation4 + $0x1], 0  ;;  %s1772_s15 = smov 0   ;;  %s1774_s16 = smov 0  }
   0x8   :  { %s1776_s17 = smov 0   ;;  %s1778_s18 = smov 0  }
   0x9 LB: > { %3020 = sst [smem:[#allocation11_spill]] %s1738_s17  ;;  %s1793_s19 = sadd.s32 4294967295, %s1742_s18   ;;  %s1742_s18 = sphi %s1778_s18, %s3108_s18   ;;  %s1738_s17 = sphi %s1776_s17, %s3105_s17   ;;  %s1734_s16 = sphi %s1774_s16, %s3107_s16   ;;  %s1730_s15 = sphi %s1772_s15, %s3106_s15  }
   0xa   : > { %s1426_s20 = sadd.s32 4294967294, %s1742_s18   ;;  %s1797_s21 = sadd.s32 1, %s1742_s18  }
   0xb   : > { %s56_s22 = sadd.s32 1, %s1738_s17  ;;  %s53_s23 = ssub.s32 %s1742_s18, %s1797_s21 }
   0xc   : > { %p63_p0 = scmp.ne.s32.totalorder %s1738_s17, %s1734_s16  ;;  %p54_p1 = scmp.eq.s32.totalorder %s53_s23, 0 }
   0xd   : > { %p64_p2 = scmp.eq.s32.totalorder %s1742_s18, 0  ;;  %p69_p3 = scmp.ne.s32.totalorder %s1734_s16, %s1730_s15 }
   0xe   : > { %p70_p4 = scmp.eq.s32.totalorder %s1793_s19, 0  ;;  %p145_p7 = scmp.eq.s32.totalorder %s1793_s19, 1 }
   0xf   : > { %s1809_s24 = scalar_select %p54_p1, %s1738_s17, %s56_s22  }
  0x10   : > { %p1811_p5 = por %p64_p2, %p63_p0  ;;  %p1815_p6 = por %p70_p4, %p69_p3 }
  0x11   : > { %3021 = sst [smem:[#allocation12_spill]] %s1809_s24  ;;  %p151_p8 = scmp.eq.s32.totalorder %s1426_s20, 1 }
  0x12   : > { %p1467_p10 = scmp.lt.s32.totalorder %s1742_s18, 2  ;;  %p1822_p11 = por %p145_p7, %p63_p0 }
  0x13   : > { %p1826_p12 = por %p151_p8, %p69_p3  ;;  %s1831_s29 = sand.u32 1, %s1738_s17  }
  0x14   : > { %s1443_s30 = sshll.u32 %s1742_s18, 6  ;;  %s1429_s5 = sshll.u32 %s1831_s29, 6 }
  0x15   : > { %s3026_s1 = sld [smem:[#allocation23_spill]]  ;;  %s182_s10 = scalar_lea.vmem [#allocation2], %s1429_s5 }
  0x16   : > { %s190_s11 = sshll.u32 %s182_s10, 4  ;;  %p1840_p13 = pnand %p1467_p10, %p1811_p5  ;;  %s191_s11 = int_to_ptr.vmem [resolvable:$true] %s190_s11 }
  0x17   : > { %p1436_p0 = scmp.ge.s32.totalorder %s1742_s18, 1  ;;  %p228_p1 = scmp.lt.s32.totalorder %s1742_s18, 3 }
  0x18   : > { %s179_s13 = scalar_lea.sflag [#allocation3], %s1831_s29  ;;  %p1616_p3 = pneg %p1840_p13 }
  0x1b   : > { %s187_s8 = scalar_lea.hbm %s3026_s1, %s1443_s30  ;;  %s1619_s25 = scalar_lea.hbm %s3026_s1, 128 }
  0x1c   : > { %s188_s9 = sshll.u32 %s187_s8, 4  ;;  %s189_s9 = int_to_ptr.hbm [resolvable:$true] %s188_s9 }
  0x1d   : > { %s1612_s14 = sshra.s32 %s189_s9, 4  ;;  %s1613_s14 = int_to_ptr.hbm [resolvable:$true] %s1612_s14 }
  0x1e   : > { %s1614_s20 = scalar_lea.hbm %s1613_s14, 64  ;;  %p1620_p5 = scmp.lt.s32.totalorder %s1613_s14, %s3026_s1 }
  0x1f   : > { %p1615_p2 = scmp.ne.s32.totalorder %s1613_s14, %s1614_s20  ;;  %p1621_p8 = scmp.lt.s32.totalorder %s1619_s25, %s1614_s20 }
  0x21   : > { %p1617_p4 = pnand %p1616_p3, %p1615_p2  ;;  %p1622_p10 = por %p1621_p8, %p1620_p5 }
  0x23   : > { %p1618_p7 = pneg %p1617_p4 }
  0x25   : > { %p1623_p9 = pnand %p1622_p10, %p1618_p7 }
  0x27   : > { %1626 = shalt.err (!%p1623_p9)
}
  0x28   : > { %s1744_s6 = smov 128   ;;  %s1745_s7 = smov 8  }
  0x29   : > { %1459 = dma.hbm_to_vmem [thread:$0]  (!%p1840_p13), %s189_s9, 1024, %s191_s11, %s179_s13, %s1744_s6, %s1744_s6, %s1745_s7  }
  0x2a   : > { %p1864_p2 = pnand %p1436_p0, %p228_p1  ;;  %s1432_s10 = sshll.u32 %s1831_s29, 7 }
  0x2b   : > { %s1445_s14 = sshll.u32 %s1742_s18, 7  ;;  %s204_s30 = scalar_lea.vmem [#allocation5], %s1432_s10 }
  0x2c   : > { %s210_s23 = scalar_lea.hbm %s3013_s2, %s1445_s14  ;;  %s213_s5 = sshll.u32 %s204_s30, 4  ;;  %s214_s5 = int_to_ptr.vmem [resolvable:$true] %s213_s5 }
  0x2d   : > { %s211_s25 = sshll.u32 %s210_s23, 4  ;;  %s201_s1 = scalar_lea.sflag [#allocation6], %s1831_s29  ;;  %s212_s25 = int_to_ptr.hbm [resolvable:$true] %s211_s25 }
  0x2e   : > { %s1642_s24 = sshra.s32 %s212_s25, 4  ;;  %s1649_s17 = scalar_lea.hbm %s3013_s2, 256  ;;  %s1643_s24 = int_to_ptr.hbm [resolvable:$true] %s1642_s24 }
  0x2f   : > { %s1644_s9 = scalar_lea.hbm %s1643_s24, 128  ;;  %p1650_p4 = scmp.lt.s32.totalorder %s1643_s24, %s3013_s2 }
  0x30   : > { %p1645_p9 = scmp.ne.s32.totalorder %s1643_s24, %s1644_s9  ;;  %p1651_p7 = scmp.lt.s32.totalorder %s1649_s17, %s1644_s9 }
  0x32   : > { %p1647_p0 = pnand %p1645_p9, %p1616_p3  ;;  %p1652_p5 = por %p1651_p7, %p1650_p4 }
  0x34   : > { %p1648_p1 = pneg %p1647_p0 }
  0x36   : > { %p1653_p8 = pnand %p1652_p5, %p1648_p1 }
  0x38   : > { %1656 = shalt.err (!%p1653_p8)
}
  0x39   : > { %1462 = dma.hbm_to_vmem [thread:$0]  (!%p1840_p13), %s212_s25, 2048, %s214_s5, %s201_s1, %s1744_s6, %s1744_s6, %s1745_s7  }
  0x3a   : > { %232 = sbr.rel (%p1864_p2) target bundleno = 1064 (0x428), region = 36 }
  0x3f   : > { %s1888_s29 = sand.u32 1, %s1734_s16  }
  0x40   : > { %s1437_s10 = sshll.u32 %s1888_s29, 6  ;;  %s235_s22 = scalar_lea.sflag [#allocation3], %s1888_s29 }
  0x41   : > { %s1892_s23 = scalar_lea.vmem [#allocation2], %s1437_s10 }
  0x42   : > { %1717 = dma.done.wait (%p1815_p6), %s235_s22, 1024  }
  0x43   : > { %1719 = vsyncadd (%p1815_p6), %s235_s22, 4294966272  ;;  %s1438_s1 = sshll.u32 %s1888_s29, 7  ;;  %s245_s17 = scalar_lea.sflag [#allocation6], %s1888_s29 }
  0x44   : > { %s1900_s24 = scalar_lea.vmem [#allocation5], %s1438_s1 }
  0x45   : > { %1721 = dma.done.wait (%p1815_p6), %s245_s17, 2048  }
  0x46   : > { %1723 = vsyncadd (%p1815_p6), %s245_s17, 4294965248  ;;  %p286_p13 = scmp.lt.s32.totalorder %s1793_s19, 1  ;;  %v1919_v1 = vld [vmem:[%s1892_s23 + $0x8] sm:$0xff]  ;;  %v1926_v4 = vld [vmem:[%s1892_s23 + $0x18] sm:$0xff]  ;;  %v796_v20 = vlaneseq  ;;  %s1309_s13 = scalar_lea.hbm %s3015_s4, %s1793_s19 }
  0x47   : > { %v337_v3 = vmul.f32 %v1919_v1, %v1919_v1  ;;  %v339_v5 = vmul.f32 %v1926_v4, %v1926_v4  ;;  %v1931_v6 = vld [vmem:[%s1892_s23 + $0x10] sm:$0xff]  ;;  %v1934_v7 = vld [vmem:[%s1892_s23 + $0x20] sm:$0xff]  ;;  %v1944_v11 = vld [vmem:[%s1892_s23 + $0x38] sm:$0xff]  ;;  %s285_s20 = scalar_lea.vmem [#allocation7], %s1888_s29  ;;  %s1313_s10 = sshll.u32 %s1309_s13, 4  ;;  %s1314_s10 = int_to_ptr.hbm [resolvable:$true] %s1313_s10 }
  0x48   : > { %s1908_s12 = scalar_select %p286_p13, %s1793_s19, 1  ;;  %v338_v8 = vmul.f32 %v1931_v6, %v1931_v6  ;;  %v340_v9 = vmul.f32 %v1934_v7, %v1934_v7  ;;  %v1941_v10 = vld [vmem:[%s1892_s23 + $0x30] sm:$0xff]  ;;  %v343_v13 = vmul.f32 %v1944_v11, %v1944_v11  ;;  %v1951_v14 = vld [vmem:[%s1900_s24 + $0x8] sm:$0xff]  ;;  %v1961_v18 = vld [vmem:[%s1900_s24 + $0x20] sm:$0xff]  ;;  %v797_v23 = vshrl.u32 %v796_v20, 7 }
  0x49   : > { %346 = vadd.xlane.f32.xlu1 %v337_v3  ;;  %350 = vadd.xlane.f32.xlu2 %v339_v5  ;;  %v342_v12 = vmul.f32 %v1941_v10, %v1941_v10  ;;  %v1954_v15 = vld [vmem:[%s1900_s24 + $0x10] sm:$0xff]  ;;  %v449_v16 = vmul.f32 %v1951_v14, %v1951_v14  ;;  %v1964_v19 = vld [vmem:[%s1892_s23] sm:$0xff]  ;;  %v1967_v21 = vld [vmem:[%s1900_s24 + $0x28] sm:$0xff]  ;;  %v452_v24 = vmul.f32 %v1961_v18, %v1961_v18  ;;  %s1311_s14 = sshll.u32 %s285_s20, 4  ;;  %s1301_s1 = scalar_lea.sflag [#allocation4], %s1888_s29  ;;  %s1312_s14 = int_to_ptr.vmem [resolvable:$true] %s1311_s14 }
  0x4a   : > { %s1439_s6 = sshll.u32 %s1908_s12, 3  ;;  %v450_v17 = vmul.f32 %v1954_v15, %v1954_v15  ;;  %v336_v22 = vmul.f32 %v1964_v19, %v1964_v19  ;;  %v453_v25 = vmul.f32 %v1967_v21, %v1967_v21  ;;  %v1977_v26 = vld [vmem:[%s1892_s23 + $0x28] sm:$0xff]  ;;  %1504 = vset.pattern.permute.xlu1 %v797_v23  ;;  %1505 = vset.pattern.permute.xlu2 %v797_v23  ;;  %v1982_v28 = vld [vmem:[%s1900_s24 + $0x38] sm:$0xff]  ;;  %v1985_v29 = vld [vmem:[%s1900_s24 + $0x40] sm:$0xff]  ;;  %s1686_s17 = sshra.s32 %s1314_s10, 4  ;;  %s1687_s17 = int_to_ptr.hbm [resolvable:$true] %s1686_s17 }
  0x4b   : > { %s289_s25 = scalar_lea.vmem %s3011_s0, %s1439_s6  ;;  %1506 = vset.pattern.permute.xlu0 %v797_v23  ;;  %v341_v27 = vmul.f32 %v1977_v26, %v1977_v26  ;;  %v455_v30 = vmul.f32 %v1982_v28, %v1982_v28  ;;  %v456_v31 = vmul.f32 %v1985_v29, %v1985_v29  ;;  %v305_v32 = vld [vmem:[%s1900_s24] sm:$0xff]  ;;  %v1993_v34 = vld [vmem:[%s1900_s24 + $0x50] sm:$0xff]  ;;  %v1996_v35 = vld [vmem:[%s1900_s24 + $0x58] sm:$0xff]  ;;  %s295_s5 = scalar_lea.vmem %s3014_s3, %s1439_s6 }
  0x4c   : > { %v1916_v0 = vld [vmem:[%s289_s25] sm:$0xff]  ;;  %v448_v33 = vmul.f32 %v305_v32, %v305_v32  ;;  %v458_v36 = vmul.f32 %v1993_v34, %v1993_v34  ;;  %v459_v37 = vmul.f32 %v1996_v35, %v1996_v35  ;;  %v2003_v38 = vld [vmem:[%s1900_s24 + $0x18] sm:$0xff]  ;;  %v2008_v40 = vld [vmem:[%s1900_s24 + $0x68] sm:$0xff]  ;;  %s1692_s6 = scalar_lea.hbm %s3015_s4, 2  ;;  %p1693_p2 = scmp.lt.s32.totalorder %s1687_s17, %s3015_s4 }
  0x4d   : > { %v322_v2 = vmul.f32 %v1916_v0, %v1916_v0  ;;  %v451_v39 = vmul.f32 %v2003_v38, %v2003_v38  ;;  %v2011_v41 = vld [vmem:[%s1900_s24 + $0x70] sm:$0xff]  ;;  %v461_v42 = vmul.f32 %v2008_v40, %v2008_v40  ;;  %v2023_v46 = vld [vmem:[%s1900_s24 + $0x48] sm:$0xff]  ;;  %v2028_v48 = vld [vmem:[%s1900_s24 + $0x60] sm:$0xff] }
  0x4e   : > { %v462_v43 = vmul.f32 %v2011_v41, %v2011_v41  ;;  %v2018_v44 = vld [vmem:[%s1900_s24 + $0x30] sm:$0xff]  ;;  %v457_v47 = vmul.f32 %v2023_v46, %v2023_v46  ;;  %v460_v49 = vmul.f32 %v2028_v48, %v2028_v48  ;;  %v2037_v50 = vld [vmem:[%s295_s5] sm:$0xff]  ;;  %v2042_v53 = vld [vmem:[%s1900_s24 + $0x78] sm:$0xff]  ;;  %s1688_s24 = scalar_lea.hbm %s1687_s17, 1 }
  0x4f   : > { %323 = vadd.xlane.f32.xlu0 %v322_v2  ;;  %v454_v45 = vmul.f32 %v2018_v44, %v2018_v44  ;;  %v795_v51 = vperm.slane %v2037_v50, 0  ;;  %v802_v52 = vperm.slane %v2037_v50, 1  ;;  %v463_v54 = vmul.f32 %v2042_v53, %v2042_v53  ;;  %p1689_p6 = scmp.ne.s32.totalorder %s1687_s17, %s1688_s24  ;;  %p1694_p9 = scmp.lt.s32.totalorder %s1692_s6, %s1688_s24 }
  0x51   : > { %348 = vadd.xlane.f32.xlu1 %v338_v8  ;;  %352 = vadd.xlane.f32.xlu2 %v340_v9  ;;  %p1690_p3 = pnand %p1689_p6, %p1822_p11  ;;  %p1695_p0 = por %p1694_p9, %p1693_p2 }
  0x53   : > { %p1691_p10 = pneg %p1690_p3 }
  0x55   : > { %p1696_p1 = pnand %p1695_p0, %p1691_p10 }
  0x57   : > { %344 = vadd.xlane.f32.xlu0 %v336_v22 }
  0x59   : > { %356 = vadd.xlane.f32.xlu1 %v342_v12  ;;  %358 = vadd.xlane.f32.xlu2 %v343_v13 }
  0x5f   : > { %354 = vadd.xlane.f32.xlu0 %v341_v27 }
  0x61   : > { %466 = vadd.xlane.f32.xlu1 %v449_v16  ;;  %468 = vadd.xlane.f32.xlu2 %v450_v17 }
  0x67   : > { %464 = vadd.xlane.f32.xlu0 %v448_v33 }
  0x69   : > { %472 = vadd.xlane.f32.xlu1 %v452_v24  ;;  %474 = vadd.xlane.f32.xlu2 %v453_v25 }
  0x6f   : > { %470 = vadd.xlane.f32.xlu0 %v451_v39 }
  0x71   : > { %478 = vadd.xlane.f32.xlu1 %v455_v30  ;;  %480 = vadd.xlane.f32.xlu2 %v456_v31 }
  0x77   : > { %476 = vadd.xlane.f32.xlu0 %v454_v45 }
  0x79   : > { %484 = vadd.xlane.f32.xlu1 %v458_v36  ;;  %486 = vadd.xlane.f32.xlu2 %v459_v37 }
  0x7f   : > { %482 = vadd.xlane.f32.xlu0 %v457_v47 }
  0x81   : > { %490 = vadd.xlane.f32.xlu1 %v461_v42  ;;  %492 = vadd.xlane.f32.xlu2 %v462_v43 }
  0x87   : > { %488 = vadd.xlane.f32.xlu0 %v460_v49 }
  0x8f   : > { %494 = vadd.xlane.f32.xlu0 %v463_v54 }
  0x99   : > { %807 = vperm.xlu2 %1505, %v802_v52  }
  0x9a   : > { %800 = vperm.xlu1 %1504, %v795_v51  }
  0xbc   : > { %v347_v45 = vpop.xlane.xlu1 %346  ;;  %v351_v47 = vpop.xlane.xlu2 %350 }
  0xc2   : > { %v324_v55 = vpop.xlane.xlu0 %323 }
  0xc3   : > { %v325_v56 = vmax.f32 %v324_v55, 1e-24 }
  0xc4   : > { %v349_v51 = vpop.xlane.xlu1 %348  ;;  %v353_v52 = vpop.xlane.xlu2 %352 }
  0xc5   : > { %1510 = vrsqrt.f32 %v325_v56  ;;  %vm332_vm1 = vweird.f32 %v325_v56 }
  0xca   : > { %v345_v49 = vpop.xlane.xlu0 %344 }
  0xcb   : > { %v1511_v57 = vpop.eup %1510 }
  0xcc   : > { %v327_v58 = vmul.f32 %v1511_v57, %v325_v56  ;;  %vm333_vm0 = vweird.f32 %v1511_v57 }
  0xcd   : > { %vm334_vm2 = vmor %vm332_vm1, %vm333_vm0 }
  0xce   : > { %v328_v59 = vmul.f32 %v1511_v57, %v327_v58 }
  0xd0   : > { %v329_v60 = vmul.f32 0.5, %v328_v59 }
  0xd2   : > { %v330_v61 = vsub.f32 1.5, %v329_v60  ;;  %v355_v54 = vpop.xlane.xlu0 %354  ;;  %v809_v60 = vperm.slane %v2037_v50, 2 }
  0xd4   : > { %v331_v62 = vmul.f32 %v1511_v57, %v330_v61 }
  0xd6   : > { %v335_v63 = vsel %vm334_vm2, %v1511_v57, %v331_v62 }
  0xd7   : > { %v672_v2 = vmul.f32 10.0, %v335_v63  ;;  %v2087_v63 = vmax.f32 %v345_v49, 1e-24 }
  0xd9   : > { %v673_v3 = vmul.f32 %v672_v2, %v1916_v0  ;;  %v2089_v2 = vmax.f32 %v347_v45, 1e-24  ;;  %1512 = vrsqrt.f32 %v2087_v63  ;;  %vm374_vm3 = vweird.f32 %v2087_v63 }
  0xdb   : > { %v682_v5 = vperm.slane %v673_v3, 0  ;;  %v675_v8 = vrot.slane %v673_v3, 1  ;;  %v676_v13 = vrot.slane %v673_v3, 2  ;;  %v678_v22 = vrot.slane %v673_v3, 4 }
  0xdc   : > { %v677_v0 = vrot.slane %v673_v3, 3  ;;  %v679_v30 = vrot.slane %v673_v3, 5  ;;  %v681_v31 = vrot.slane %v673_v3, 7  ;;  %v680_v39 = vrot.slane %v673_v3, 6 }
  0xdd   : > { %v730_v9 = vmul.f32 %v682_v5, %v305_v32  ;;  %v698_v12 = vmul.f32 %v682_v5, %v1964_v19  ;;  %v683_v16 = vperm.slane %v675_v8, 0  ;;  %v684_v23 = vperm.slane %v676_v13, 0 }
  0xde   : > { %v686_v24 = vperm.slane %v678_v22, 0  ;;  %v731_v25 = vmul.f32 %v682_v5, %v1951_v14  ;;  %v685_v32 = vperm.slane %v677_v0, 0  ;;  %v687_v33 = vperm.slane %v679_v30, 0 }
  0xdf   : > { %746 = vadd.xlane.f32.xlu0 %v730_v9  ;;  %706 = vadd.xlane.f32.xlu1 %v698_v12  ;;  %v699_v17 = vmul.f32 %v683_v16, %v1919_v1  ;;  %v700_v27 = vmul.f32 %v684_v23, %v1931_v6  ;;  %v689_v36 = vperm.slane %v681_v31, 0  ;;  %v688_v14 = vperm.slane %v680_v39, 0 }
  0xe0   : > { %v702_v19 = vmul.f32 %v686_v24, %v1934_v7  ;;  %v701_v1 = vmul.f32 %v685_v32, %v1926_v4  ;;  %v703_v37 = vmul.f32 %v687_v33, %v1977_v26  ;;  %v733_v7 = vmul.f32 %v683_v16, %v2003_v38 }
  0xe1   : > { %708 = vadd.xlane.f32.xlu2 %v699_v17  ;;  %v705_v6 = vmul.f32 %v689_v36, %v1944_v11  ;;  %v704_v42 = vmul.f32 %v688_v14, %v1941_v10  ;;  %v732_v43 = vmul.f32 %v683_v16, %v1954_v15  ;;  %v734_v4 = vmul.f32 %v684_v23, %v1961_v18  ;;  %v2103_v16 = vpop.eup %1512 }
  0xe2   : > { %v736_v26 = vmul.f32 %v685_v32, %v2018_v44  ;;  %v735_v11 = vmul.f32 %v684_v23, %v1967_v21  ;;  %v737_v10 = vmul.f32 %v685_v32, %v1982_v28  ;;  %v739_v38 = vmul.f32 %v686_v24, %v2023_v46  ;;  %v357_v21 = vpop.xlane.xlu1 %356  ;;  %v359_v28 = vpop.xlane.xlu2 %358 }
  0xe3   : > { %v738_v15 = vmul.f32 %v686_v24, %v1985_v29  ;;  %v740_v18 = vmul.f32 %v687_v33, %v1993_v34  ;;  %v742_v44 = vmul.f32 %v688_v14, %v2028_v48  ;;  %v741_v55 = vmul.f32 %v687_v33, %v1996_v35  ;;  %v2069_v29 = vpop.xlane.xlu0 %464 }
  0xe4   : > { %v743_v46 = vmul.f32 %v688_v14, %v2008_v40  ;;  %v745_v56 = vmul.f32 %v689_v36, %v2042_v53  ;;  %v744_v34 = vmul.f32 %v689_v36, %v2011_v41  ;;  %v823_v53 = vperm.slane %v2037_v50, 4 }
  0xe5   : > { %v816_v41 = vperm.slane %v2037_v50, 3  ;;  %v837_v3 = vperm.slane %v2037_v50, 6  ;;  %v830_v8 = vperm.slane %v2037_v50, 5  ;;  %v2096_v9 = vmax.f32 %v351_v47, 1e-24 }
  0xe6   : > { %1514 = vrsqrt.f32 %v2089_v2  ;;  %v2101_v13 = vmax.f32 %v349_v51, 1e-24  ;;  %v2108_v22 = vmax.f32 %v353_v52, 1e-24  ;;  %v844_v23 = vperm.slane %v2037_v50, 7 }
  0xe7   : > { %748 = vadd.xlane.f32.xlu1 %v731_v25  ;;  %710 = vadd.xlane.f32.xlu0 %v700_v27  ;;  %1516 = vrsqrt.f32 %v2096_v9  ;;  %v369_v25 = vmul.f32 %v2103_v16, %v2087_v63  ;;  %v2117_v27 = vmax.f32 %v359_v28, 1e-24  ;;  %v2125_v50 = vmax.f32 %v355_v54, 1e-24 }
  0xe8   : > { %1518 = vrsqrt.f32 %v2101_v13  ;;  %vm375_vm4 = vweird.f32 %v2103_v16  ;;  %vm384_vm5 = vweird.f32 %v2089_v2  ;;  %vm404_vm8 = vweird.f32 %v2096_v9 }
  0xe9   : > { %714 = vadd.xlane.f32.xlu2 %v702_v19  ;;  %1520 = vrsqrt.f32 %v2108_v22  ;;  %v370_v33 = vmul.f32 %v2103_v16, %v369_v25  ;;  %vm2186_vm6 = vmor %vm374_vm3, %vm375_vm4  ;;  %vm394_vm9 = vweird.f32 %v2101_v13  ;;  %vm414_vm15 = vweird.f32 %v2108_v22 }
  0xea   : > { %v467_v57 = vpop.xlane.xlu1 %466  ;;  %v469_v48 = vpop.xlane.xlu2 %468  ;;  %1522 = vrsqrt.f32 %v2117_v27  ;;  %vm444_vm1 = vweird.f32 %v2117_v27  ;;  %vm424_vm3 = vweird.f32 %v2125_v50 }
  0xeb   : > { %v2072_v58 = vpop.xlane.xlu0 %470  ;;  %v2127_v31 = vmax.f32 %v467_v57, 1e-24  ;;  %v2139_v39 = vmax.f32 %v469_v48, 1e-24  ;;  %1524 = vrsqrt.f32 %v2125_v50 }
  0xec   : > { %v2112_v24 = vpop.eup %1514 }
  0xed   : > { %v2121_v30 = vpop.eup %1516  ;;  %v379_v19 = vmul.f32 %v2112_v24, %v2089_v2  ;;  %1526 = vrsqrt.f32 %v2127_v31  ;;  %vm385_vm7 = vweird.f32 %v2112_v24 }
  0xee   : > { %v2132_v36 = vpop.eup %1518  ;;  %vm2209_vm10 = vmor %vm384_vm5, %vm385_vm7  ;;  %vm405_vm11 = vweird.f32 %v2121_v30 }
  0xef   : > { %712 = vadd.xlane.f32.xlu1 %v701_v1  ;;  %716 = vadd.xlane.f32.xlu0 %v703_v37  ;;  %v2134_v1 = vmax.f32 %v357_v21, 1e-24  ;;  %v399_v37 = vmul.f32 %v2121_v30, %v2096_v9  ;;  %vm395_vm12 = vweird.f32 %v2132_v36  ;;  %vm2234_vm13 = vmor %vm404_vm8, %vm405_vm11 }
  0xf0   : > { %vm2246_vm14 = vmor %vm394_vm9, %vm395_vm12 }
  0xf1   : > { %720 = vadd.xlane.f32.xlu2 %v705_v6  ;;  %v380_v6 = vmul.f32 %v2112_v24, %v379_v19  ;;  %1528 = vrsqrt.f32 %v2134_v1  ;;  %v400_v45 = vmul.f32 %v2121_v30, %v399_v37  ;;  %vm434_vm5 = vweird.f32 %v2134_v1 }
  0xf2   : > { %v2074_v59 = vpop.xlane.xlu1 %472  ;;  %v2076_v35 = vpop.xlane.xlu2 %474  ;;  %1530 = vrsqrt.f32 %v2139_v39 }
  0xf3   : > { %v2079_v40 = vpop.xlane.xlu0 %476  ;;  %v401_v52 = vmul.f32 0.5, %v400_v45  ;;  %v2184_v48 = vmax.f32 %v2074_v59, 1e-24 }
  0xf5   : > { %v402_v63 = vsub.f32 1.5, %v401_v52  ;;  %1532 = vrsqrt.f32 %v2184_v48 }
  0xf7   : > { %718 = vadd.xlane.f32.xlu1 %v704_v42  ;;  %752 = vadd.xlane.f32.xlu0 %v733_v7  ;;  %v2145_v42 = vpop.eup %1520  ;;  %v389_v7 = vmul.f32 %v2132_v36, %v2101_v13  ;;  %v2223_v2 = vmul.f32 %v2121_v30, %v402_v63 }
  0xf8   : > { %v2155_v47 = vpop.eup %1522  ;;  %vm415_vm0 = vweird.f32 %v2145_v42 }
  0xf9   : > { %750 = vadd.xlane.f32.xlu2 %v732_v43  ;;  %v371_v43 = vmul.f32 0.5, %v370_v33  ;;  %v2162_v51 = vpop.eup %1524  ;;  %vm2286_vm2 = vmor %vm414_vm15, %vm415_vm0  ;;  %v2298_v33 = vmax.f32 %v2072_v58, 1e-24  ;;  %vm445_vm9 = vweird.f32 %v2155_v47 }
  0xfa   : > { %v2082_v61 = vpop.xlane.xlu1 %478  ;;  %v2085_v62 = vpop.xlane.xlu2 %480  ;;  %vm425_vm4 = vweird.f32 %v2162_v51 }
  0xfb   : > { %v2093_v5 = vpop.xlane.xlu0 %482  ;;  %vm2328_vm8 = vmor %vm424_vm3, %vm425_vm4 }
  0xff   : > { %754 = vadd.xlane.f32.xlu1 %v734_v4  ;;  %758 = vadd.xlane.f32.xlu0 %v736_v26  ;;  %v381_v4 = vmul.f32 0.5, %v380_v6  ;;  %v409_v26 = vmul.f32 %v2145_v42, %v2108_v22  ;;  %v2307_v22 = vmax.f32 %v2079_v40, 1e-24 }
 0x101   : > { %756 = vadd.xlane.f32.xlu2 %v735_v11  ;;  %v390_v11 = vmul.f32 %v2132_v36, %v389_v7  ;;  %v382_v21 = vsub.f32 1.5, %v381_v4  ;;  %v2227_v4 = vmax.f32 %v2082_v61, 1e-24 }
 0x102   : > { %v2099_v12 = vpop.xlane.xlu1 %484  ;;  %v2106_v17 = vpop.xlane.xlu2 %486 }
 0x103   : > { %v2119_v0 = vpop.xlane.xlu0 %488  ;;  %v391_v28 = vmul.f32 0.5, %v390_v11  ;;  %v2275_v63 = vmax.f32 %v2106_v17, 1e-24 }
 0x105   : > { %v392_v37 = vsub.f32 1.5, %v391_v28 }
 0x107   : > { %760 = vadd.xlane.f32.xlu1 %v737_v10  ;;  %764 = vadd.xlane.f32.xlu0 %v739_v38  ;;  %v372_v38 = vsub.f32 1.5, %v371_v43  ;;  %v393_v61 = vmul.f32 %v2132_v36, %v392_v37 }
 0x109   : > { %762 = vadd.xlane.f32.xlu2 %v738_v15  ;;  %v2164_v15 = vpop.eup %1526 }
 0x10a   : > { %v2129_v32 = vpop.xlane.xlu1 %490  ;;  %v2142_v14 = vpop.xlane.xlu2 %492  ;;  %v523_v57 = vmul.f32 %v2164_v15, %v2127_v31  ;;  %vm529_vm7 = vweird.f32 %v2164_v15 }
 0x10b   : > { %v2160_v10 = vpop.xlane.xlu0 %494 }
 0x10c   : > { %v524_v7 = vmul.f32 %v2164_v15, %v523_v57 }
 0x10f   : > { %766 = vadd.xlane.f32.xlu1 %v740_v18  ;;  %770 = vadd.xlane.f32.xlu0 %v742_v44  ;;  %v2168_v18 = vpop.eup %1528  ;;  %v410_v44 = vmul.f32 %v2145_v42, %v409_v26 }
 0x110   : > { %vm435_vm12 = vweird.f32 %v2168_v18 }
 0x111   : > { %768 = vadd.xlane.f32.xlu2 %v741_v55  ;;  %v2173_v55 = vpop.eup %1530  ;;  %vm2416_vm15 = vmor %vm434_vm5, %vm435_vm12  ;;  %vm588_vm5 = vweird.f32 %v2227_v4 }
 0x112   : > { %v2158_v49 = vpop.permute.xlu1 %800  ;;  %v2171_v54 = vpop.permute.xlu2 %807  ;;  %v533_v59 = vmul.f32 %v2173_v55, %v2139_v39 }
 0x113   : > { %3029 = vst [vmem:[#allocation13_spill] sm:$0xff] %v2158_v49  ;;  %v2262_v13 = vpop.eup %1532 }
 0x114   : > { %3030 = vst [vmem:[#allocation14_spill] sm:$0xff] %v2171_v54  ;;  %v534_v45 = vmul.f32 %v2173_v55, %v533_v59 }
 0x116   : > { %v2264_v57 = vmul.f32 0.5, %v534_v45  ;;  %v2337_v45 = vmax.f32 %v2129_v32, 1e-24 }
 0x117   : > { %772 = vadd.xlane.f32.xlu1 %v743_v46  ;;  %776 = vadd.xlane.f32.xlu0 %v745_v56  ;;  %v419_v46 = vmul.f32 %v2162_v51, %v2125_v50  ;;  %v373_v56 = vmul.f32 %v2103_v16, %v372_v38 }
 0x119   : > { %774 = vadd.xlane.f32.xlu2 %v744_v34  ;;  %v439_v34 = vmul.f32 %v2155_v47, %v2117_v27  ;;  %v377_v19 = vsel %vm2186_vm6, %v2103_v16, %v373_v56  ;;  %v525_v56 = vmul.f32 0.5, %v524_v7  ;;  %vm528_vm6 = vweird.f32 %v2127_v31 }
 0x11a   : > { %vm2383_vm11 = vmor %vm528_vm6, %vm529_vm7 }
 0x11b   : > { %v440_v6 = vmul.f32 %v2155_v47, %v439_v34  ;;  %v407_v34 = vsel %vm2234_vm13, %v2121_v30, %v2223_v2  ;;  %v526_v17 = vsub.f32 1.5, %v525_v56  ;;  %v536_v56 = vsub.f32 1.5, %v2264_v57 }
 0x11c   : > { %vm538_vm13 = vweird.f32 %v2139_v39 }
 0x12b   : > { %814 = vperm.xlu0 %1506, %v809_v60   ;;  %v2268_v60 = vmax.f32 %v2099_v12, 1e-24  ;;  %v2377_v12 = vmax.f32 %v2119_v0, 1e-24 }
 0x130   : > { %828 = vperm.xlu1 %1504, %v823_v53   ;;  %v429_v53 = vmul.f32 %v2168_v18, %v2134_v1 }
 0x131   : > { %821 = vperm.xlu2 %1505, %v816_v41   ;;  %v2194_v41 = vmax.f32 %v2076_v35, 1e-24 }
 0x132   : > { %v430_v16 = vmul.f32 %v2168_v18, %v429_v53 }
 0x133   : > { %1534 = vrsqrt.f32 %v2194_v41  ;;  %vm568_vm3 = vweird.f32 %v2194_v41 }
 0x134   : > { %v2255_v9 = vmul.f32 0.5, %v430_v16  ;;  %1536 = vrsqrt.f32 %v2227_v4 }
 0x138   : > { %842 = vperm.xlu1 %1504, %v837_v3   ;;  %v411_v3 = vmul.f32 0.5, %v410_v44  ;;  %v2239_v44 = vmax.f32 %v2085_v62, 1e-24  ;;  %v2253_v62 = vand.u32 127, %v796_v20 }
 0x139   : > { %835 = vperm.xlu2 %1505, %v830_v8   ;;  %v383_v8 = vmul.f32 %v2112_v24, %v382_v21  ;;  %v2271_v53 = vpop.eup %1534 }
 0x13a   : > { %v412_v38 = vsub.f32 1.5, %v411_v3  ;;  %1538 = vrsqrt.f32 %v2239_v44  ;;  %v397_v3 = vsel %vm2246_vm14, %v2132_v36, %v393_v61  ;;  %v553_v36 = vmul.f32 %v2262_v13, %v2184_v48  ;;  %v2319_v2 = vpop.eup %1536 }
 0x13b   : > { %v387_v26 = vsel %vm2209_vm10, %v2112_v24, %v383_v8  ;;  %1540 = vrsqrt.f32 %v2268_v60  ;;  %v583_v52 = vmul.f32 %v2319_v2, %v2227_v4  ;;  %vm2357_vm10 = vmor %vm444_vm1, %vm445_vm9  ;;  %vm539_vm14 = vweird.f32 %v2173_v55 }
 0x13c   : > { %v413_v20 = vmul.f32 %v2145_v42, %v412_v38  ;;  %1542 = vrsqrt.f32 %v2275_v63  ;;  %v432_v38 = vsub.f32 1.5, %v2255_v9  ;;  %vm2435_vm0 = vmor %vm538_vm13, %vm539_vm14  ;;  %vm558_vm1 = vweird.f32 %v2184_v48 }
 0x13d   : > { %vm569_vm4 = vweird.f32 %v2271_v53  ;;  %vm589_vm6 = vweird.f32 %v2319_v2  ;;  %vm598_vm7 = vweird.f32 %v2239_v44  ;;  %vm618_vm9 = vweird.f32 %v2268_v60 }
 0x13e   : > { %v417_v37 = vsel %vm2286_vm2, %v2145_v42, %v413_v20  ;;  %v554_v42 = vmul.f32 %v2262_v13, %v553_v36  ;;  %v2367_v20 = vmax.f32 %v2142_v14, 1e-24  ;;  %vm559_vm2 = vweird.f32 %v2262_v13  ;;  %vm2519_vm13 = vmor %vm568_vm3, %vm569_vm4 }
 0x13f   : > { %vm2505_vm12 = vmor %vm558_vm1, %vm559_vm2 }
 0x140   : > { %849 = vperm.xlu1 %1504, %v844_v23   ;;  %v420_v23 = vmul.f32 %v2162_v51, %v419_v46  ;;  %v441_v46 = vmul.f32 0.5, %v440_v6  ;;  %v2314_v6 = vmax.f32 %v2093_v5, 1e-24  ;;  %v2333_v5 = vpop.eup %1538  ;;  %v555_v27 = vmul.f32 0.5, %v554_v42  ;;  %vm2531_vm2 = vmor %vm588_vm5, %vm589_vm6 }
 0x141   : > { %v2362_v24 = vpop.eup %1540  ;;  %v593_v9 = vmul.f32 %v2333_v5, %v2239_v44 }
 0x142   : > { %v421_v21 = vmul.f32 0.5, %v420_v23  ;;  %v2291_v23 = vmax.f32 %v2069_v29, 1e-24  ;;  %v563_v29 = vmul.f32 %v2271_v53, %v2194_v41  ;;  %v613_v42 = vmul.f32 %v2362_v24, %v2268_v60 }
 0x143   : > { %vm619_vm14 = vweird.f32 %v2362_v24 }
 0x144   : > { %v422_v8 = vsub.f32 1.5, %v421_v21  ;;  %1544 = vrsqrt.f32 %v2291_v23  ;;  %v564_v50 = vmul.f32 %v2271_v53, %v563_v29  ;;  %v433_v29 = vmul.f32 %v2168_v18, %v432_v38  ;;  %vm2552_vm1 = vmor %vm618_vm9, %vm619_vm14 }
 0x145   : > { %1546 = vrsqrt.f32 %v2298_v33  ;;  %vm3072_vm9 = vweird.f32 %v2291_v23 }
 0x146   : > { %v423_v16 = vmul.f32 %v2162_v51, %v422_v8  ;;  %1548 = vrsqrt.f32 %v2307_v22  ;;  %v2391_v8 = vmax.f32 %v2160_v10, 1e-24  ;;  %v594_v10 = vmul.f32 %v2333_v5, %v593_v9 }
 0x147   : > { %1550 = vrsqrt.f32 %v2314_v6 }
 0x148   : > { %v427_v21 = vsel %vm2328_vm8, %v2162_v51, %v423_v16  ;;  %1552 = vrsqrt.f32 %v2337_v45  ;;  %v2421_v16 = vmul.f32 %v2173_v55, %v536_v56  ;;  %v595_v39 = vmul.f32 0.5, %v594_v10 }
 0x149   : > { %1554 = vrsqrt.f32 %v2367_v20  ;;  %vm599_vm8 = vweird.f32 %v2333_v5 }
 0x14a   : > { %1556 = vrsqrt.f32 %v2377_v12  ;;  %vm2542_vm4 = vmor %vm598_vm7, %vm599_vm8  ;;  %vm3069_vm8 = vweird.f32 %v2275_v63 }
 0x14b   : > { %1558 = vrsqrt.f32 %v2391_v8 }
 0x152   : > { %v707_v25 = vpop.xlane.xlu1 %706  ;;  %v2205_v35 = vpop.xlane.xlu0 %746 }
 0x153   : > { %v2217_v43 = vmul.f32 %v707_v25, %v377_v19  ;;  %v442_v19 = vsub.f32 1.5, %v441_v46  ;;  %v437_v46 = vsel %vm2416_vm15, %v2168_v18, %v433_v29 }
 0x154   : > { %v709_v11 = vpop.xlane.xlu2 %708 }
 0x155   : > { %3035 = vst [vmem:[#allocation15_spill] sm:$0xff] %v2217_v43  ;;  %v2241_v28 = vmul.f32 %v709_v11, %v387_v26  ;;  %v2341_v26 = vmul.f32 %v2164_v15, %v526_v17  ;;  %v443_v11 = vmul.f32 %v2155_v47, %v442_v19  ;;  %v584_v19 = vmul.f32 %v2319_v2, %v583_v52 }
 0x157   : > { %3038 = vst [vmem:[#allocation16_spill] sm:$0xff] %v2241_v28  ;;  %v447_v0 = vsel %vm2357_vm10, %v2155_v47, %v443_v11  ;;  %v556_v11 = vsub.f32 1.5, %v555_v27 }
 0x159   : > { %v2463_v29 = vmul.f32 %v2262_v13, %v556_v11 }
 0x15a   : > { %v2277_v30 = vpop.xlane.xlu1 %748  ;;  %v711_v59 = vpop.xlane.xlu0 %710 }
 0x15b   : > { %v2293_v25 = vmul.f32 %v711_v59, %v397_v3  ;;  %v2373_v59 = vpop.eup %1542 }
 0x15c   : > { %v715_v58 = vpop.xlane.xlu2 %714  ;;  %v2388_v14 = vpop.eup %1544  ;;  %vm629_vm15 = vweird.f32 %v2373_v59 }
 0x15d   : > { %3043 = vst [vmem:[#allocation17_spill] sm:$0xff] %v2293_v25  ;;  %v2316_v7 = vmul.f32 %v715_v58, %v417_v37  ;;  %v2397_v31 = vpop.eup %1546  ;;  %v513_v1 = vmul.f32 %v2388_v14, %v2291_v23  ;;  %vm519_vm3 = vweird.f32 %v2388_v14  ;;  %vm2568_vm5 = vmor %vm3069_vm8, %vm629_vm15  ;;  %vm3075_vm15 = vweird.f32 %v2298_v33 }
 0x15e   : > { %v2404_v37 = vpop.eup %1548  ;;  %vm549_vm6 = vweird.f32 %v2397_v31  ;;  %vm2576_vm14 = vmor %vm3072_vm9, %vm519_vm3  ;;  %v561_v23 = vsel %vm2505_vm12, %v2262_v13, %v2463_v29  ;;  %vm3079_vm9 = vweird.f32 %v2307_v22  ;;  %vm3082_vm12 = vweird.f32 %v2314_v6 }
 0x15f   : > { %3044 = vst [vmem:[#allocation18_spill] sm:$0xff] %v2316_v7  ;;  %v2423_v40 = vpop.eup %1550  ;;  %v573_v27 = vmul.f32 %v2404_v37, %v2307_v22  ;;  %vm2587_vm8 = vmor %vm3075_vm15, %vm549_vm6  ;;  %vm3078_vm3 = vweird.f32 %v2404_v37 }
 0x160   : > { %vm609_vm7 = vweird.f32 %v2423_v40  ;;  %vm2601_vm10 = vmor %vm3079_vm9, %vm3078_vm3  ;;  %vm913_vm3 = vcmask 1042434  }
 0x161   : > { %vm2618_vm6 = vmor %vm3082_vm12, %vm609_vm7  ;;  %vm915_vm12 = vcmask 1043459  }
 0x162   : > { %v713_v32 = vpop.xlane.xlu1 %712  ;;  %v717_v61 = vpop.xlane.xlu0 %716 }
 0x163   : > { %v2369_v51 = vmul.f32 %v713_v32, %v407_v34  ;;  %v2371_v3 = vmul.f32 %v717_v61, %v427_v21  ;;  %v565_v34 = vmul.f32 0.5, %v564_v50  ;;  %v623_v50 = vmul.f32 %v2373_v59, %v2275_v63  ;;  %v2440_v32 = vpop.eup %1552 }
 0x164   : > { %v721_v17 = vpop.xlane.xlu2 %720  ;;  %v585_v21 = vmul.f32 0.5, %v584_v19  ;;  %v543_v61 = vmul.f32 %v2397_v31, %v2298_v33  ;;  %v2465_v10 = vpop.eup %1554  ;;  %v643_v58 = vmul.f32 %v2440_v32, %v2337_v45  ;;  %vm649_vm15 = vweird.f32 %v2440_v32 }
 0x165   : > { %3049 = vst [vmem:[#allocation19_spill] sm:$0xff] %v2369_v51  ;;  %v2400_v36 = vmul.f32 %v721_v17, %v447_v0  ;;  %v566_v52 = vsub.f32 1.5, %v565_v34  ;;  %v603_v34 = vmul.f32 %v2423_v40, %v2314_v6  ;;  %v614_v17 = vmul.f32 %v2362_v24, %v613_v42 }
 0x166   : > { %3050 = vst [vmem:[#allocation20_spill] sm:$0xff] %v2371_v3  ;;  %v624_v19 = vmul.f32 %v2373_v59, %v623_v50  ;;  %v2476_v50 = vpop.eup %1556  ;;  %v544_v47 = vmul.f32 %v2397_v31, %v543_v61  ;;  %v644_v61 = vmul.f32 %v2440_v32, %v643_v58  ;;  %v653_v28 = vmul.f32 %v2465_v10, %v2367_v20 }
 0x167   : > { %3053 = vst [vmem:[#allocation21_spill] sm:$0xff] %v2400_v36  ;;  %v2473_v42 = vmul.f32 %v2271_v53, %v566_v52  ;;  %v2482_v11 = vpop.eup %1558  ;;  %v604_v18 = vmul.f32 %v2423_v40, %v603_v34  ;;  %v586_v52 = vsub.f32 1.5, %v585_v21  ;;  %v596_v36 = vsub.f32 1.5, %v595_v39 }
 0x168   : > { %v625_v54 = vmul.f32 0.5, %v624_v19  ;;  %v545_v7 = vmul.f32 0.5, %v544_v47  ;;  %v663_v21 = vmul.f32 %v2482_v11, %v2391_v8  ;;  %v645_v51 = vmul.f32 0.5, %v644_v61 }
 0x169   : > { %v605_v19 = vmul.f32 0.5, %v604_v18  ;;  %v2510_v58 = vmul.f32 %v2319_v2, %v586_v52  ;;  %v654_v52 = vmul.f32 %v2465_v10, %v653_v28  ;;  %v571_v33 = vsel %vm2519_vm13, %v2271_v53, %v2473_v42 }
 0x16a   : > { %v719_v56 = vpop.xlane.xlu1 %718  ;;  %v2447_v9 = vpop.xlane.xlu0 %752  ;;  %v626_v48 = vsub.f32 1.5, %v625_v54  ;;  %v664_v54 = vmul.f32 %v2482_v11, %v663_v21  ;;  %v546_v61 = vsub.f32 1.5, %v545_v7  ;;  %vm648_vm13 = vweird.f32 %v2337_v45  ;;  %v3093_v45 = vld [vmem:[#allocation17_spill] sm:$0xff] }
 0x16b   : > { %v2454_v0 = vmul.f32 %v719_v56, %v437_v46  ;;  %v514_v46 = vmul.f32 %v2388_v14, %v513_v1  ;;  %v574_v1 = vmul.f32 %v2404_v37, %v573_v27  ;;  %v633_v27 = vmul.f32 %v2476_v50, %v2377_v12 }
 0x16c   : > { %v2470_v56 = vpop.xlane.xlu2 %750  ;;  %v2572_v21 = vmul.f32 0.5, %v654_v52  ;;  %v591_v29 = vsel %vm2531_vm2, %v2319_v2, %v2510_v58  ;;  %vm639_vm2 = vweird.f32 %v2476_v50 }
 0x16d   : > { %3058 = vst [vmem:[#allocation22_spill] sm:$0xff] %v2454_v0  ;;  %v615_v0 = vmul.f32 0.5, %v614_v17  ;;  %v515_v3 = vmul.f32 0.5, %v514_v46  ;;  %v575_v17 = vmul.f32 0.5, %v574_v1  ;;  %v2513_v46 = vmul.f32 %v2333_v5, %v596_v36 }
 0x16f   : > { %v616_v1 = vsub.f32 1.5, %v615_v0  ;;  %v516_v49 = vsub.f32 1.5, %v515_v3  ;;  %v634_v0 = vmul.f32 %v2476_v50, %v633_v27  ;;  %v576_v4 = vsub.f32 1.5, %v575_v17 }
 0x170   : > { %v606_v3 = vsub.f32 1.5, %v605_v19  ;;  %v2562_v27 = vmul.f32 %v2373_v59, %v626_v48  ;;  %v646_v19 = vsub.f32 1.5, %v645_v51  ;;  %v665_v48 = vmul.f32 0.5, %v664_v54 }
 0x171   : > { %v2559_v44 = vmul.f32 %v2362_v24, %v616_v1  ;;  %v635_v1 = vmul.f32 0.5, %v634_v0  ;;  %v517_v63 = vmul.f32 %v2388_v14, %v516_v49  ;;  %v547_v51 = vmul.f32 %v2397_v31, %v546_v61 }
 0x172   : > { %v2496_v39 = vpop.xlane.xlu1 %754  ;;  %v2498_v34 = vpop.xlane.xlu0 %758  ;;  %v577_v0 = vmul.f32 %v2404_v37, %v576_v4  ;;  %v607_v13 = vmul.f32 %v2423_v40, %v606_v3  ;;  %v601_v53 = vsel %vm2542_vm4, %v2333_v5, %v2513_v46  ;;  %v631_v6 = vsel %vm2568_vm5, %v2373_v59, %v2562_v27 }
 0x173   : > { %v621_v2 = vsel %vm2552_vm1, %v2362_v24, %v2559_v44  ;;  %v2637_v47 = vmul.f32 %v2440_v32, %v646_v19  ;;  %v656_v5 = vsub.f32 1.5, %v2572_v21  ;;  %v521_v58 = vsel %vm2576_vm14, %v2388_v14, %v517_v63 }
 0x174   : > { %v757_v36 = vpop.xlane.xlu2 %756  ;;  %v3085_v46 = vsel %vm2435_vm0, %v2173_v55, %v2421_v16  ;;  %v636_v18 = vsub.f32 1.5, %v635_v1  ;;  %v666_v41 = vsub.f32 1.5, %v665_v48  ;;  %v551_v59 = vsel %vm2587_vm8, %v2397_v31, %v547_v51  ;;  %vm2732_vm8 = vmor %vm648_vm13, %vm649_vm15 }
 0x175   : > { %v2649_v24 = vmul.f32 %v2470_v56, %v3085_v46  ;;  %v581_v54 = vsel %vm2601_vm10, %v2404_v37, %v577_v0  ;;  %v2657_v61 = vmul.f32 %v757_v36, %v571_v33  ;;  %v611_v14 = vsel %vm2618_vm6, %v2423_v40, %v607_v13 }
 0x176   : > { %vm658_vm0 = vweird.f32 %v2367_v20  ;;  %vm659_vm1 = vweird.f32 %v2465_v10  ;;  %v2665_v55 = vadd.s32 4294967288, %v2253_v62  ;;  %v3086_v31 = vsel %vm2383_vm11, %v2164_v15, %v2341_v26 }
 0x177   : > { %v2673_v37 = vmul.f32 %v2277_v30, %v3086_v31  ;;  %v2676_v16 = vmul.f32 %v2447_v9, %v551_v59  ;;  %v2681_v40 = vmul.f32 %v2205_v35, %v521_v58  ;;  %v2684_v56 = vmul.f32 %v2496_v39, %v561_v23  ;;  %vm660_vm6 = vmor %vm658_vm0, %vm659_vm1 }
 0x178   : > { %vm638_vm10 = vweird.f32 %v2377_v12  ;;  %v890_v15 = vperm.slane %v2649_v24, %v2253_v62  ;;  %v2691_v30 = vmul.f32 %v2498_v34, %v581_v54  ;;  %v667_v35 = vmul.f32 %v2482_v11, %v666_v41 }
 0x179   : > { %v894_v9 = vperm.slane %v2657_v61, %v2665_v55  ;;  %vm668_vm11 = vweird.f32 %v2391_v8  ;;  %vm669_vm4 = vweird.f32 %v2482_v11  ;;  %vm888_vm5 = vcmask 130112   ;;  %vm2711_vm7 = vmor %vm638_vm10, %vm639_vm2 }
 0x17a   : > { %v761_v43 = vpop.xlane.xlu1 %760  ;;  %v765_v25 = vpop.xlane.xlu0 %764  ;;  %v887_v34 = vperm.slane %v2673_v37, %v2665_v55  ;;  %v891_v36 = vperm.slane %v2676_v16, %v2665_v55  ;;  %v885_v3 = vperm.slane %v2681_v40, %v2253_v62  ;;  %vm911_vm14 = vcmask 1041409   ;;  %vm2746_vm9 = vmor %vm668_vm11, %vm669_vm4 }
 0x17b   : > { %v2678_v38 = vmul.f32 %v761_v43, %v591_v29  ;;  %v637_v43 = vmul.f32 %v2476_v50, %v636_v18  ;;  %v893_v7 = vperm.slane %v2684_v56, %v2253_v62  ;;  %v2719_v44 = vmul.f32 %v765_v25, %v611_v14 }
 0x17c   : > { %v763_v42 = vpop.xlane.xlu2 %762  ;;  %v892_v60 = vsel %vm888_vm5, %v891_v36, %v890_v15  ;;  %v896_v21 = vperm.slane %v2691_v30, %v2253_v62  ;;  %v889_v63 = vsel %vm888_vm5, %v887_v34, %v885_v3  ;;  %v657_v8 = vmul.f32 %v2465_v10, %v656_v5 }
 0x17d   : > { %v2697_v39 = vmul.f32 %v763_v42, %v601_v53  ;;  %v897_v28 = vperm.slane %v2678_v38, %v2665_v55  ;;  %v895_v25 = vsel %vm888_vm5, %v894_v9, %v893_v7  ;;  %v641_v48 = vsel %vm2711_vm7, %v2476_v50, %v637_v43 }
 0x17e   : > { %v912_v51 = vsel %vm911_vm14, %v892_v60, %v889_v63  ;;  %v900_v50 = vperm.slane %v2719_v44, %v2665_v55  ;;  %v651_v13 = vsel %vm2732_vm8, %v2440_v32, %v2637_v47  ;;  %v671_v22 = vsel %vm2746_vm9, %v2482_v11, %v667_v35 }
 0x17f   : > { %v899_v1 = vperm.slane %v2697_v39, %v2253_v62  ;;  %v898_v52 = vsel %vm888_vm5, %v897_v28, %v896_v21  ;;  %v914_v49 = vsel %vm913_vm3, %v895_v25, %v912_v51  ;;  %vm917_vm13 = vcmask 1044484  }
 0x180   : > { %v916_v42 = vsel %vm915_vm12, %v898_v52, %v914_v49  ;;  %vm919_vm15 = vcmask 1045509   ;;  %v661_v20 = vsel %vm660_vm6, %v2465_v10, %v657_v8  ;;  %vm921_vm0 = vcmask 1046534  }
 0x181   : > { %vm923_vm1 = vcmask 1047559   ;;  %vm926_vm10 = vcmask 130048   ;;  %v1746_v43 = vmov 0   ;;  %vm1075_vm2 = vcmask 64512  }
 0x182   : > { %v767_v26 = vpop.xlane.xlu1 %766  ;;  %v771_v57 = vpop.xlane.xlu0 %770  ;;  %1507 = vset.pattern.permute.xlu1 %v1746_v43  ;;  %1508 = vset.pattern.permute.xlu0 %v1746_v43  ;;  %vm1298_vm8 = vcmask 8192  }
 0x183   : > { %v2724_v12 = vmul.f32 %v767_v26, %v621_v2  ;;  %v2757_v0 = vmul.f32 %v771_v57, %v641_v48  ;;  %v901_v2 = vsel %vm888_vm5, %v900_v50, %v899_v1  ;;  %1509 = vset.pattern.permute.xlu2 %v1746_v43 }
 0x184   : > { %v769_v27 = vpop.xlane.xlu2 %768  ;;  %v918_v18 = vsel %vm917_vm13, %v901_v2, %v916_v42 }
 0x185   : > { %v2726_v17 = vmul.f32 %v769_v27, %v631_v6  ;;  %v902_v33 = vperm.slane %v2724_v12, %v2253_v62  ;;  %v905_v11 = vperm.slane %v2757_v0, %v2253_v62 }
 0x187   : > { %v903_v23 = vperm.slane %v2726_v17, %v2665_v55 }
 0x189   : > { %v904_v32 = vsel %vm888_vm5, %v903_v23, %v902_v33 }
 0x18a   : > { %v773_v29 = vpop.xlane.xlu1 %772  ;;  %v777_v53 = vpop.xlane.xlu0 %776  ;;  %v920_v59 = vsel %vm919_vm15, %v904_v32, %v918_v18 }
 0x18b   : > { %v2776_v6 = vmul.f32 %v773_v29, %v651_v13  ;;  %v2779_v47 = vmul.f32 %v777_v53, %v671_v22 }
 0x18c   : > { %v775_v58 = vpop.xlane.xlu2 %774 }
 0x18d   : > { %v906_v5 = vperm.slane %v2776_v6, %v2665_v55  ;;  %v2786_v46 = vmul.f32 %v775_v58, %v661_v20  ;;  %v909_v54 = vperm.slane %v2779_v47, %v2665_v55  ;;  %v3095_v20 = vld [vmem:[#allocation13_spill] sm:$0xff] }
 0x18f   : > { %v907_v41 = vsel %vm888_vm5, %v906_v5, %v905_v11  ;;  %v908_v14 = vperm.slane %v2786_v46, %v2253_v62  ;;  %v3094_v5 = vld [vmem:[#allocation15_spill] sm:$0xff] }
 0x190   : > { %v922_v31 = vsel %vm921_vm0, %v907_v41, %v920_v59  ;;  %v2846_v58 = vmul.f32 %v3095_v20, %v3094_v5 }
 0x191   : > { %v910_v10 = vsel %vm888_vm5, %v909_v54, %v908_v14 }
 0x192   : > { %v924_v15 = vsel %vm923_vm1, %v910_v10, %v922_v31  ;;  %v3096_v10 = vld [vmem:[#allocation19_spill] sm:$0xff] }
 0x193   : > { %v927_v26 = vsel %vm926_vm10, %v924_v15, -inf }
 0x194   : > { %928 = vmax.xlane.f32.xlu2 %v927_v26  ;;  %v2799_v57 = vpop.permute.xlu2 %821 }
 0x195   : > { %v2853_v15 = vmul.f32 %v2799_v57, %v3096_v10 }
 0x19c   : > { %v2801_v35 = vpop.permute.xlu2 %835 }
 0x207   : > { %v929_v9 = vpop.xlane.xlu2 %928 }
 0x208   : > { %v2803_v34 = vperm.slane %v929_v9, 0  ;;  %v2805_v36 = vperm.slane %v929_v9, 2  ;;  %v2807_v28 = vperm.slane %v929_v9, 5  ;;  %v2815_v27 = vperm.slane %v929_v9, 1 }
 0x209   : > { %v934_v52 = vperm.slane %v929_v9, 3  ;;  %v2838_v13 = vperm.slane %v929_v9, 7  ;;  %v935_v22 = vperm.slane %v929_v9, 4 }
 0x20a   : > { %v976_v4 = vsub.f32 %v2657_v61, %v2805_v36  ;;  %v972_v3 = vsub.f32 %v2673_v37, %v2803_v34  ;;  %v971_v7 = vsub.f32 %v2681_v40, %v2803_v34  ;;  %v982_v25 = vsub.f32 %v2726_v17, %v2807_v28  ;;  %v2821_v61 = vpop.permute.xlu0 %814 }
 0x20b   : > { %v974_v1 = vsub.f32 %v2676_v16, %v2815_v27  ;;  %v973_v37 = vsub.f32 %v2649_v24, %v2815_v27  ;;  %v2825_v40 = vperm.slane %v929_v9, 6  ;;  %v2829_v63 = vmul.f32 %v2821_v61, %v3093_v45 }
 0x20c   : > { %v997_v60 = vmul.f32 1.442695, %v976_v4  ;;  %v989_v21 = vmul.f32 1.442695, %v972_v3  ;;  %v987_v19 = vmul.f32 1.442695, %v971_v7  ;;  %v977_v49 = vsub.f32 %v2691_v30, %v934_v52  ;;  %v2856_v3 = vpop.permute.xlu1 %828 }
 0x20d   : > { %v1009_v48 = vmul.f32 1.442695, %v982_v25  ;;  %v993_v23 = vmul.f32 1.442695, %v974_v1  ;;  %v991_v51 = vmul.f32 1.442695, %v973_v37  ;;  %v949_v16 = vsub.f32 %v2829_v63, %v2805_v36 }
 0x20e   : > { %1560 = vpow2.f32 %v997_v60  ;;  %v984_v24 = vsub.f32 %v2776_v6, %v2825_v40  ;;  %v975_v33 = vsub.f32 %v2684_v56, %v2805_v36  ;;  %v999_v53 = vmul.f32 1.442695, %v977_v49 }
 0x20f   : > { %1562 = vpow2.f32 %v989_v21  ;;  %v986_v6 = vsub.f32 %v2779_v47, %v2838_v13  ;;  %v979_v30 = vsub.f32 %v2697_v39, %v935_v22  ;;  %v978_v56 = vsub.f32 %v2678_v38, %v934_v52  ;;  %v3097_v21 = vld [vmem:[#allocation18_spill] sm:$0xff] }
 0x210   : > { %1564 = vpow2.f32 %v987_v19  ;;  %v1013_v29 = vmul.f32 1.442695, %v984_v24  ;;  %v995_v2 = vmul.f32 1.442695, %v975_v33  ;;  %v947_v59 = vsub.f32 %v2846_v58, %v2803_v34 }
 0x211   : > { %1566 = vpow2.f32 %v1009_v48  ;;  %v1017_v18 = vmul.f32 1.442695, %v986_v6  ;;  %v1003_v41 = vmul.f32 1.442695, %v979_v30  ;;  %v1001_v14 = vmul.f32 1.442695, %v978_v56 }
 0x212   : > { %1568 = vpow2.f32 %v993_v23  ;;  %v955_v39 = vmul.f32 1.442695, %v947_v59  ;;  %v980_v38 = vsub.f32 %v2719_v44, %v935_v22  ;;  %v950_v26 = vsub.f32 %v2853_v15, %v934_v52  ;;  %v3098_v23 = vld [vmem:[#allocation20_spill] sm:$0xff] }
 0x213   : > { %1570 = vpow2.f32 %v991_v51  ;;  %v981_v44 = vsub.f32 %v2724_v12, %v2807_v28  ;;  %v2862_v19 = vmul.f32 %v2856_v3, %v3097_v21  ;;  %v983_v52 = vsub.f32 %v2757_v0, %v2825_v40  ;;  %v3099_v51 = vld [vmem:[#allocation16_spill] sm:$0xff] }
 0x214   : > { %v1561_v17 = vpop.eup %1560  ;;  %1572 = vpow2.f32 %v1013_v29  ;;  %v1005_v9 = vmul.f32 1.442695, %v980_v38  ;;  %v961_v7 = vmul.f32 1.442695, %v950_v26  ;;  %v2876_v49 = vpop.permute.xlu1 %842  ;;  %v959_v5 = vmul.f32 1.442695, %v949_v16 }
 0x215   : > { %v1563_v50 = vpop.eup %1562  ;;  %1111 = vperm.xlu2 %1509, %v1561_v17   ;;  %1574 = vpow2.f32 %v999_v53  ;;  %v951_v25 = vsub.f32 %v2862_v19, %v935_v22  ;;  %v1007_v37 = vmul.f32 1.442695, %v981_v44  ;;  %v2870_v17 = vmul.f32 %v2801_v35, %v3098_v23 }
 0x216   : > { %v1565_v8 = vpop.eup %1564  ;;  %1099 = vperm.xlu0 %1508, %v1563_v50   ;;  %1576 = vpow2.f32 %v995_v2  ;;  %v3100_v50 = vld [vmem:[#allocation14_spill] sm:$0xff]  ;;  %v1011_v29 = vmul.f32 1.442695, %v983_v52 }
 0x217   : > { %1096 = vperm.xlu1 %1507, %v1565_v8   ;;  %v1567_v42 = vpop.eup %1566  ;;  %1578 = vpow2.f32 %v1017_v18  ;;  %v963_v45 = vmul.f32 1.442695, %v951_v25  ;;  %v860_v8 = vmul.f32 %v3100_v50, %v3099_v51  ;;  %v952_v24 = vsub.f32 %v2870_v17, %v2807_v28 }
 0x218   : > { %v1569_v32 = vpop.eup %1568  ;;  %1580 = vpow2.f32 %v1003_v41  ;;  %v3102_v41 = vld [vmem:[#allocation21_spill] sm:$0xff] }
 0x219   : > { %v1571_v11 = vpop.eup %1570  ;;  %1582 = vpow2.f32 %v1001_v14  ;;  %v948_v22 = vsub.f32 %v860_v8, %v2815_v27  ;;  %v965_v53 = vmul.f32 1.442695, %v952_v24 }
 0x21a   : > { %v1573_v54 = vpop.eup %1572  ;;  %1584 = vpow2.f32 %v955_v39  ;;  %v985_v39 = vsub.f32 %v2786_v46, %v2838_v13  ;;  %v1203_v46 = vsub.f32 0.5, %v860_v8 }
 0x21b   : > { %v1575_v31 = vpop.eup %1574  ;;  %1586 = vpow2.f32 %v1005_v9  ;;  %v1202_v9 = vsub.f32 0.5, %v2846_v58 }
 0x21c   : > { %v1577_v47 = vpop.eup %1576  ;;  %1588 = vpow2.f32 %v961_v7  ;;  %v850_v27 = vpop.permute.xlu1 %849  ;;  %v1015_v10 = vmul.f32 1.442695, %v985_v39  ;;  %v1211_v44 = vmax.f32 %v1203_v46, 0.0 }
 0x21d   : > { %1129 = vperm.xlu2 %1509, %v1567_v42   ;;  %v1579_v43 = vpop.eup %1578  ;;  %1590 = vpow2.f32 %v1007_v37  ;;  %v957_v42 = vmul.f32 1.442695, %v948_v22  ;;  %v866_v59 = vmul.f32 %v850_v27, %v3102_v41  ;;  %v1210_v7 = vmax.f32 %v1202_v9, 0.0 }
 0x21e   : > { %1105 = vperm.xlu0 %1508, %v1569_v32   ;;  %v1581_v34 = vpop.eup %1580  ;;  %1592 = vpow2.f32 %v963_v45  ;;  %v3101_v32 = vld [vmem:[#allocation22_spill] sm:$0xff]  ;;  %v1219_v21 = vmul.f32 %v1211_v44, %v3100_v50  ;;  %v1206_v45 = vsub.f32 0.5, %v2862_v19 }
 0x21f   : > { %1102 = vperm.xlu1 %1507, %v1571_v11   ;;  %v1583_v4 = vpop.eup %1582  ;;  %1594 = vpow2.f32 %v1011_v29  ;;  %v2882_v11 = vmul.f32 %v2876_v49, %v3101_v32  ;;  %v954_v14 = vsub.f32 %v866_v59, %v2838_v13  ;;  %v1218_v13 = vmul.f32 %v1210_v7, %v3095_v20 }
 0x220   : > { %v1585_v60 = vpop.eup %1584  ;;  %1596 = vpow2.f32 %v965_v53 }
 0x221   : > { %v1019_v1 = vmul.f32 %v1585_v60, %v3095_v20  ;;  %v1587_v48 = vpop.eup %1586  ;;  %v953_v28 = vsub.f32 %v2882_v11, %v2825_v40  ;;  %1598 = vpow2.f32 %v957_v42  ;;  %v1204_v60 = vsub.f32 0.5, %v2829_v63 }
 0x222   : > { %v1589_v12 = vpop.eup %1588  ;;  %v1214_v20 = vmax.f32 %v1206_v45, 0.0 }
 0x223   : > { %v1022_v33 = vmul.f32 %v1589_v12, %v2799_v57  ;;  %v1591_v0 = vpop.eup %1590  ;;  %v967_v56 = vmul.f32 1.442695, %v953_v28  ;;  %v1212_v25 = vmax.f32 %v1204_v60, 0.0  ;;  %v1209_v12 = vsub.f32 0.5, %v866_v59 }
 0x224   : > { %v1593_v2 = vpop.eup %1592  ;;  %v1222_v52 = vmul.f32 %v1214_v20, %v2856_v3 }
 0x225   : > { %1135 = vperm.xlu2 %1509, %v1573_v54   ;;  %v1023_v6 = vmul.f32 %v1593_v2, %v2856_v3  ;;  %v1595_v30 = vpop.eup %1594  ;;  %1600 = vpow2.f32 %v967_v56  ;;  %v1220_v58 = vmul.f32 %v1212_v25, %v2821_v61  ;;  %v1217_v63 = vmax.f32 %v1209_v12, 0.0 }
 0x226   : > { %1114 = vperm.xlu0 %1508, %v1575_v31   ;;  %v1597_v18 = vpop.eup %1596  ;;  %1602 = vpow2.f32 %v959_v5 }
 0x227   : > { %1108 = vperm.xlu1 %1507, %v1577_v47   ;;  %v1599_v54 = vpop.eup %1598  ;;  %v1024_v40 = vmul.f32 %v1597_v18, %v2801_v35  ;;  %v969_v47 = vmul.f32 1.442695, %v954_v14 }
 0x228   : > { %v1020_v31 = vmul.f32 %v1599_v54, %v3100_v50 }
 0x229   : > { %1604 = vpow2.f32 %v969_v47 }
 0x22a   : > { %1606 = vpow2.f32 %v1015_v10 }
 0x22b   : > { %v1601_v36 = vpop.eup %1600 }
 0x22c   : > { %v1603_v16 = vpop.eup %1602  ;;  %v1025_v38 = vmul.f32 %v1601_v36, %v2876_v49 }
 0x22d   : > { %1141 = vperm.xlu2 %1509, %v1579_v43   ;;  %v1021_v26 = vmul.f32 %v1603_v16, %v2821_v61  ;;  %v1225_v61 = vmul.f32 %v1217_v63, %v850_v27 }
 0x22e   : > { %1120 = vperm.xlu0 %1508, %v1581_v34  }
 0x22f   : > { %1117 = vperm.xlu1 %1507, %v1583_v4   ;;  %v1605_v43 = vpop.eup %1604 }
 0x230   : > { %v1026_v34 = vmul.f32 %v1605_v43, %v850_v27  ;;  %v1607_v4 = vpop.eup %1606 }
 0x236   : > { %1036 = vperm.xlu0 %1508, %v1019_v1   ;;  %v1205_v1 = vsub.f32 0.5, %v2853_v15 }
 0x237   : > { %1123 = vperm.xlu1 %1507, %v1587_v48  }
 0x238   : > { %v1213_v37 = vmax.f32 %v1205_v1, 0.0 }
 0x23a   : > { %v1221_v48 = vmul.f32 %v1213_v37, %v2799_v57 }
 0x23e   : > { %1045 = vperm.xlu0 %1508, %v1022_v33  }
 0x23f   : > { %1126 = vperm.xlu1 %1507, %v1591_v0  }
 0x246   : > { %1048 = vperm.xlu0 %1508, %v1023_v6  }
 0x247   : > { %1132 = vperm.xlu1 %1507, %v1595_v30  }
 0x24e   : > { %1051 = vperm.xlu0 %1508, %v1024_v40  }
 0x24f   : > { %1039 = vperm.xlu1 %1507, %v1020_v31  }
 0x256   : > { %1054 = vperm.xlu0 %1508, %v1025_v38  }
 0x257   : > { %1042 = vperm.xlu1 %1507, %v1021_v26  }
 0x25e   : > { %1057 = vperm.xlu0 %1508, %v1026_v34  }
 0x25f   : > { %1138 = vperm.xlu1 %1507, %v1607_v4  }
 0x266   : > { %1247 = vperm.xlu0 %1508, %v1218_v13  }
 0x26e   : > { %1250 = vperm.xlu0 %1508, %v1219_v21  }
 0x26f   : > { %v1112_v42 = vpop.permute.xlu2 %1111 }
 0x270   : > { %v1150_v31 = vperm.slane %v1112_v42, %v2665_v55  ;;  %v1207_v42 = vsub.f32 0.5, %v2870_v17 }
 0x276   : > { %1253 = vperm.xlu0 %1508, %v1220_v58  }
 0x277   : > { %v1130_v6 = vpop.permute.xlu2 %1129 }
 0x278   : > { %v1159_v60 = vperm.slane %v1130_v6, %v2665_v55 }
 0x27e   : > { %1256 = vperm.xlu0 %1508, %v1221_v48  }
 0x27f   : > { %v1136_v27 = vpop.permute.xlu2 %1135 }
 0x280   : > { %v1162_v1 = vperm.slane %v1136_v27, %v2665_v55 }
 0x286   : > { %1259 = vperm.xlu0 %1508, %v1222_v52  }
 0x287   : > { %v1142_v58 = vpop.permute.xlu2 %1141 }
 0x288   : > { %v1100_v23 = vpop.permute.xlu0 %1099 }
 0x289   : > { %v1097_v51 = vpop.permute.xlu1 %1096  ;;  %v1144_v50 = vperm.slane %v1100_v23, %v2665_v55 }
 0x28a   : > { %v1143_v15 = vperm.slane %v1097_v51, %v2253_v62 }
 0x28c   : > { %v1145_v8 = vsel %vm888_vm5, %v1144_v50, %v1143_v15 }
 0x28e   : > { %1268 = vperm.xlu0 %1508, %v1225_v61   ;;  %v1165_v61 = vperm.slane %v1142_v58, %v2665_v55 }
 0x290   : > { %v1106_v57 = vpop.permute.xlu0 %1105 }
 0x291   : > { %v1103_v24 = vpop.permute.xlu1 %1102  ;;  %v1147_v18 = vperm.slane %v1106_v57, %v2665_v55 }
 0x292   : > { %v1146_v5 = vperm.slane %v1103_v24, %v2253_v62 }
 0x294   : > { %v1148_v47 = vsel %vm888_vm5, %v1147_v18, %v1146_v5 }
 0x295   : > { %v1167_v37 = vsel %vm911_vm14, %v1148_v47, %v1145_v8 }
 0x298   : > { %v1115_v19 = vpop.permute.xlu0 %1114 }
 0x299   : > { %v1109_v33 = vpop.permute.xlu1 %1108  ;;  %v1152_v16 = vperm.slane %v1115_v19, %v2253_v62 }
 0x29a   : > { %v1149_v59 = vperm.slane %v1109_v33, %v2253_v62 }
 0x29c   : > { %v1151_v43 = vsel %vm888_vm5, %v1150_v31, %v1149_v59 }
 0x29d   : > { %v1168_v20 = vsel %vm913_vm3, %v1151_v43, %v1167_v37 }
 0x2a0   : > { %v1121_v29 = vpop.permute.xlu0 %1120 }
 0x2a1   : > { %v1118_v22 = vpop.permute.xlu1 %1117  ;;  %v1155_v7 = vperm.slane %v1121_v29, %v2253_v62 }
 0x2a2   : > { %v1153_v39 = vperm.slane %v1118_v22, %v2665_v55 }
 0x2a4   : > { %v1154_v21 = vsel %vm888_vm5, %v1153_v39, %v1152_v16 }
 0x2a5   : > { %v1169_v23 = vsel %vm915_vm12, %v1154_v21, %v1168_v20 }
 0x2a8   : > { %v1037_v3 = vpop.permute.xlu0 %1036 }
 0x2a9   : > { %v1124_v0 = vpop.permute.xlu1 %1123  ;;  %v1059_v14 = vperm.slane %v1037_v3, %v2253_v62 }
 0x2aa   : > { %v1156_v38 = vperm.slane %v1124_v0, %v2665_v55 }
 0x2ac   : > { %v1157_v48 = vsel %vm888_vm5, %v1156_v38, %v1155_v7 }
 0x2ad   : > { %v1170_v8 = vsel %vm917_vm13, %v1157_v48, %v1169_v23 }
 0x2b0   : > { %v1046_v53 = vpop.permute.xlu0 %1045 }
 0x2b1   : > { %v1127_v2 = vpop.permute.xlu1 %1126  ;;  %v1062_v10 = vperm.slane %v1046_v53, %v2253_v62  ;;  %v1208_v53 = vsub.f32 0.5, %v2882_v11 }
 0x2b2   : > { %v1158_v9 = vperm.slane %v1127_v2, %v2253_v62 }
 0x2b3   : > { %v1216_v2 = vmax.f32 %v1208_v53, 0.0 }
 0x2b4   : > { %v1160_v52 = vsel %vm888_vm5, %v1159_v60, %v1158_v9 }
 0x2b5   : > { %v1171_v33 = vsel %vm919_vm15, %v1160_v52, %v1170_v8 }
 0x2b8   : > { %v1049_v32 = vpop.permute.xlu0 %1048 }
 0x2b9   : > { %v1133_v28 = vpop.permute.xlu1 %1132  ;;  %v1063_v34 = vperm.slane %v1049_v32, %v2253_v62  ;;  %v1215_v32 = vmax.f32 %v1207_v42, 0.0 }
 0x2ba   : > { %v1161_v46 = vperm.slane %v1133_v28, %v2253_v62  ;;  %v1224_v28 = vmul.f32 %v1216_v2, %v2876_v49 }
 0x2bb   : > { %v1223_v6 = vmul.f32 %v1215_v32, %v2801_v35 }
 0x2bc   : > { %v1163_v51 = vsel %vm888_vm5, %v1162_v1, %v1161_v46 }
 0x2bd   : > { %v1172_v3 = vsel %vm921_vm0, %v1163_v51, %v1171_v33 }
 0x2c0   : > { %v1052_v30 = vpop.permute.xlu0 %1051 }
 0x2c1   : > { %v1040_v56 = vpop.permute.xlu1 %1039  ;;  %v1064_v13 = vperm.slane %v1052_v30, %v2253_v62 }
 0x2c2   : > { %v1060_v41 = vperm.slane %v1040_v56, %v2253_v62 }
 0x2c4   : > { %v1067_v26 = vsel %vm911_vm14, %v1060_v41, %v1059_v14 }
 0x2c8   : > { %v1055_v54 = vpop.permute.xlu0 %1054 }
 0x2c9   : > { %v1043_v40 = vpop.permute.xlu1 %1042  ;;  %v1065_v12 = vperm.slane %v1055_v54, %v2253_v62 }
 0x2ca   : > { %v1061_v36 = vperm.slane %v1043_v40, %v2253_v62 }
 0x2cc   : > { %v1068_v4 = vsel %vm913_vm3, %v1061_v36, %v1067_v26 }
 0x2cd   : > { %v1069_v44 = vsel %vm915_vm12, %v1062_v10, %v1068_v4 }
 0x2ce   : > { %v1070_v25 = vsel %vm917_vm13, %v1063_v34, %v1069_v44 }
 0x2cf   : > { %v1071_v45 = vsel %vm919_vm15, %v1064_v13, %v1070_v25 }
 0x2d0   : > { %v1058_v63 = vpop.permute.xlu0 %1057  ;;  %v1072_v24 = vsel %vm921_vm0, %v1065_v12, %v1071_v45 }
 0x2d1   : > { %v1139_v50 = vpop.permute.xlu1 %1138  ;;  %v1066_v15 = vperm.slane %v1058_v63, %v2253_v62 }
 0x2d2   : > { %v1164_v57 = vperm.slane %v1139_v50, %v2253_v62 }
 0x2d3   : > { %v1073_v19 = vsel %vm923_vm1, %v1066_v15, %v1072_v24 }
 0x2d4   : > { %v1076_v29 = vsel %vm1075_vm2, %v1073_v19, 0.0  ;;  %v1166_v22 = vsel %vm888_vm5, %v1165_v61, %v1164_v57 }
 0x2d5   : > { %1077 = vadd.xlane.f32.xlu1 %v1076_v29  ;;  %v1173_v0 = vsel %vm923_vm1, %v1166_v22, %v1172_v3 }
 0x2d6   : > { %v1175_v55 = vsel %vm926_vm10, %v1173_v0, 0.0 }
 0x2d7   : > { %1176 = vadd.xlane.f32.xlu2 %v1175_v55 }
 0x2d8   : > { %v1248_v30 = vpop.permute.xlu0 %1247 }
 0x2d9   : > { %v1270_v39 = vperm.slane %v1248_v30, %v2253_v62 }
 0x2e0   : > { %v1251_v56 = vpop.permute.xlu0 %1250 }
 0x2e1   : > { %v1271_v31 = vperm.slane %v1251_v56, %v2253_v62 }
 0x2e3   : > { %v1278_v26 = vsel %vm911_vm14, %v1271_v31, %v1270_v39  ;;  %vm1226_vm14 = vcmask 7168  }
 0x2e8   : > { %v1254_v27 = vpop.permute.xlu0 %1253 }
 0x2e9   : > { %v1272_v36 = vperm.slane %v1254_v27, %v2253_v62 }
 0x2eb   : > { %v1279_v46 = vsel %vm913_vm3, %v1272_v36, %v1278_v26 }
 0x2ee   : > { %1265 = vperm.xlu1 %1507, %v1224_v28  }
 0x2ef   : > { %1262 = vperm.xlu2 %1509, %v1223_v6  }
 0x2f0   : > { %v1257_v41 = vpop.permute.xlu0 %1256 }
 0x2f1   : > { %v1273_v38 = vperm.slane %v1257_v41, %v2253_v62 }
 0x2f3   : > { %v1280_v60 = vsel %vm915_vm12, %v1273_v38, %v1279_v46 }
 0x2f8   : > { %v1260_v14 = vpop.permute.xlu0 %1259 }
 0x2f9   : > { %v1274_v43 = vperm.slane %v1260_v14, %v2253_v62 }
 0x2fb   : > { %v1281_v1 = vsel %vm917_vm13, %v1274_v43, %v1280_v60 }
 0x300   : > { %v1269_v13 = vpop.permute.xlu0 %1268 }
 0x301   : > { %v1277_v37 = vperm.slane %v1269_v13, %v2253_v62 }
 0x348   : > { %v1078_v5 = vpop.xlane.xlu1 %1077 }
 0x349   : > { %v1178_v34 = vadd.f32 1e-10, %v1078_v5 }
 0x34a   : > { %v1177_v18 = vpop.xlane.xlu2 %1176 }
 0x34b   : > { %v1179_v59 = vadd.f32 %v1177_v18, %v1078_v5 }
 0x34d   : > { %v1180_v54 = vadd.f32 1e-10, %v1179_v59 }
 0x34f   : > { %1608 = vrcp.f32 %v1180_v54  ;;  %v1192_v49 = vand.u32 2147483648, %v1180_v54  ;;  %v1190_v35 = vand.u32 2147483647, %v1180_v54  ;;  %vm1186_vm4 = vweird.f32 %v1180_v54 }
 0x351   : > { %v1193_v9 = vor.u32 1.1754944e-38, %v1192_v49  ;;  %vm1191_vm7 = vcmp.eq.f32.partialorder %v1190_v35, 8.507059e+37 }
 0x352   : > { %v1263_v16 = vpop.permute.xlu2 %1262 }
 0x353   : > { %v1275_v4 = vperm.slane %v1263_v16, %v2253_v62 }
 0x355   : > { %v1609_v11 = vpop.eup %1608  ;;  %v1282_v48 = vsel %vm919_vm15, %v1275_v4, %v1281_v1 }
 0x356   : > { %v1182_v17 = vmul.f32 %v1609_v11, %v1180_v54  ;;  %vm1187_vm11 = vweird.f32 %v1609_v11 }
 0x357   : > { %vm1188_vm5 = vmor %vm1186_vm4, %vm1187_vm11 }
 0x358   : > { %v1183_v40 = vsub.f32 1.0, %v1182_v17 }
 0x35a   : > { %v1184_v47 = vmul.f32 %v1609_v11, %v1183_v40 }
 0x35c   : > { %v1185_v10 = vadd.f32 %v1609_v11, %v1184_v47 }
 0x35e   : > { %v1189_v7 = vsel %vm1188_vm5, %v1609_v11, %v1185_v10 }
 0x35f   : > { %v1194_v44 = vsel %vm1191_vm7, %v1193_v9, %v1189_v7 }
 0x360   : > { %v1266_v21 = vpop.permute.xlu1 %1265  ;;  %v1195_v25 = vmul.f32 %v1194_v44, %v1178_v34 }
 0x361   : > { %v1276_v58 = vperm.slane %v1266_v21, %v2253_v62 }
 0x362   : > { %1610 = vlog2.f32 %v1195_v25  ;;  %v1196_v12 = vsub.f32 1.0, %v1195_v25 }
 0x363   : > { %v1283_v45 = vsel %vm921_vm0, %v1276_v58, %v1282_v48 }
 0x364   : > { %v1284_v20 = vsel %vm923_vm1, %v1277_v37, %v1283_v45  ;;  %v1200_v50 = vmul.f32 %v1196_v12, %v1196_v12 }
 0x365   : > { %v1286_v52 = vsel %vm1075_vm2, %v1284_v20, 0.0 }
 0x366   : > { %1287 = vadd.xlane.f32.xlu2 %v1286_v52 }
 0x368   : > { %v1611_v63 = vpop.eup %1610 }
 0x369   : > { %v1198_v23 = vmul.f32 0.6931472, %v1611_v63 }
 0x36b   : > { %v1199_v51 = vsub.f32 0.0, %v1198_v23 }
 0x36d   : > { %v1201_v15 = vmul.f32 %v1200_v50, %v1199_v51 }
 0x36f   : > { %v1227_v61 = vsel %vm1226_vm14, %v1201_v15, 0.0 }
 0x370   : > { %1228 = vadd.xlane.f32.xlu0 %v1227_v61 }
 0x3d9   : > { %v1288_v62 = vpop.xlane.xlu2 %1287 }
 0x3da   : > { %v1289_v8 = vrot.slane %v1288_v62, 4 }
 0x3dc   : > { %v1290_v57 = vadd.f32 %v1289_v8, %v1288_v62 }
 0x3de   : > { %v1291_v24 = vrot.slane %v1290_v57, 2 }
 0x3e0   : > { %v1292_v22 = vadd.f32 %v1291_v24, %v1290_v57 }
 0x3e2   : > { %v1293_v55 = vrot.slane %v1292_v22, 1 }
 0x3e3   : > { %v1229_v19 = vpop.xlane.xlu0 %1228 }
 0x3e4   : > { %v1230_v33 = vrot.slane %v1229_v19, 4  ;;  %v1294_v2 = vadd.f32 %v1293_v55, %v1292_v22 }
 0x3e6   : > { %v1231_v29 = vadd.f32 %v1230_v33, %v1229_v19 }
 0x3e8   : > { %v1232_v3 = vrot.slane %v1231_v29, 2 }
 0x3ea   : > { %v1233_v0 = vadd.f32 %v1232_v3, %v1231_v29 }
 0x3ec   : > { %v1234_v53 = vrot.slane %v1233_v0, 1 }
 0x3ee   : > { %v1235_v42 = vadd.f32 %v1234_v53, %v1233_v0 }
 0x3f0   : > { %1446 = vpush %v1235_v42 }
 0x3f1   : > { %1448 = vpush %v1294_v2 }
 0x421   : > { %s1447_s22 = spop %1446 }
 0x422   : > { %v1237_v32 = vstv %s1447_s22  ;;  %s1449_s23 = spop %1448 }
 0x423   : > { %v1296_v28 = vstv %s1449_s23 }
 0x424   : > { %v1297_v6 = vsel %vm1226_vm14, %v1237_v32, %v1296_v28 }
 0x425   : > { %1299 = vst.msk [vmem:[%s285_s20] sm:$0x1] %vm1298_vm8, %v1297_v6 }
 0x426   : > { %1699 = shalt.err (!%p1696_p1)
}
 0x427   : > { %1454 = dma.vmem_to_hbm [thread:$0]  (%p1822_p11), %s1312_s14, 16, %s1314_s10, %s1301_s1  }
 0x428 PF: > { %s1325_s29 = sand.u32 1, %s1730_s15   ;;  %p3103_p4 = scmp.ge.s32.totalorder %s1742_s18, 2 }
 0x429   : > { %s1326_s25 = scalar_lea.sflag [#allocation4], %s1325_s29 }
 0x42a   : > { %p1464_p7 = pnand %p3103_p4, %p1826_p12 }
 0x42c   : > { %p1465_p5 = pneg %p1464_p7 }
 0x42e   : > { %1725 = dma.done.wait (%p1465_p5), %s1326_s25, 16  }
 0x42f   : > { %1727 = vsyncadd (%p1465_p5), %s1326_s25, 4294967280  ;;  %s3104_s26 = sld [smem:[#allocation11_spill]]  ;;  %p20_p8 = scmp.ge.s32.totalorder %s1797_s21, 4  }
 0x430   : > { %s3105_s17 = sld [smem:[#allocation12_spill]]  ;;  %s3106_s15 = smov %s1734_s16 }
 0x431   : > { %s3108_s18 = smov %s1797_s21  ;;  %22 = sbr.rel (!%p20_p8) target bundleno = 9 (0x9), region = 100 }
 0x435   : > { %s3107_s16 = smov %s3104_s26 }
 0x436   :  { %1331 = vsyncpa [#allocation3], 1 }
 0x437   :  { %1333 = vsyncpa [#allocation3 + $0x1], 1 }
 0x438   :  { %1334 = vsyncpa [#allocation6], 1 }
 0x439   :  { %1336 = vsyncpa [#allocation6 + $0x1], 1 }
 0x43a   :  { %1337 = vsyncpa [#allocation4], 1 }
 0x43b   :  { %1339 = vsyncpa [#allocation4 + $0x1], 1 }

</bundles_post_ra>
